<compile_context>
chip_gen: v7x
topology: tpu7x:2x2x1
jax: 0.10.0
libtpu: 0.0.40
codegen_flags: <defaults>
</compile_context>

<pallas_src>
import functools

import jax
import jax.numpy as jnp
from jax.experimental import pallas as pl
from jax.experimental.pallas import tpu as pltpu

EPS = 1e-5


# --------------------------------------------------------------------------- utils
def _round_up(x, m):
    return (x + m - 1) // m * m


def _tpu_vmem_capacity():
    """Physical per-core VMEM in bytes (generation aware); conservative fallback."""
    try:
        cap = int(getattr(pltpu.get_tpu_info(), "vmem_capacity_bytes", 0))
        if cap > 0:
            return cap
    except Exception:
        pass
    return 64 * 1024 * 1024           # v7x per-TC VMEM; safe lower bound for v5e/v6e


def _pick_tile_n(N, L, Cp, budget_bytes):
    """Largest batch tile (dividing N) whose (Cp, tn*L) f32 slab fits the per-tile
    budget while keeping the lane extent 128-aligned (or equal to the full N*L)."""
    for tn in range(N, 0, -1):
        if N % tn:
            continue
        T = tn * L
        if tn != N and T % 128 != 0:
            continue
        if Cp * T * 4 <= budget_bytes:
            return tn
    # Nothing fits the budget: smallest 128-aligned divisor, else the whole batch.
    for tn in range(1, N + 1):
        if N % tn == 0 and (tn * L) % 128 == 0:
            return tn
    # TODO(synk): halo-based L-axis tiling here instead of a single oversized tile.
    return N


# -------------------------------------------------------------- in-kernel helpers
def _conv3_masked(a, L, wl_ref, wc_ref, wr_ref, mxu_dtype):
    """3-tap conv along the lane axis as three accumulating MXU matmuls.
    Taps never cross sequence boundaries (L-periodic multiplicative masks)."""
    T = a.shape[1]
    seq_pos = jax.lax.broadcasted_iota(jnp.int32, (1, T), 1) % L
    left_m = (seq_pos >= 1).astype(a.dtype)          # tap at p-1 stays in-sequence
    right_m = (seq_pos <= L - 2).astype(a.dtype)     # tap at p+1 stays in-sequence
    left = pltpu.roll(a, shift=1, axis=1) * left_m
    right = pltpu.roll(a, shift=T - 1, axis=1) * right_m
    # TODO(synk): on v6e/v7x cast `a` to bf16 before the roll/mask prolog (packed
    #             VPU/XLU); kept f32 here for v5e compatibility / lowering safety.
    y = jnp.dot(wc_ref[...], a.astype(mxu_dtype), preferred_element_type=jnp.float32)
    y = y + jnp.dot(wl_ref[...], left.astype(mxu_dtype),
                    preferred_element_type=jnp.float32)
    y = y + jnp.dot(wr_ref[...], right.astype(mxu_dtype),
                    preferred_element_type=jnp.float32)
    return y


# ------------------------------------------------------------ small-slab fast path
def _resblock_fused_kernel(x_ref, w1l_ref, w1c_ref, w1r_ref, w2l_ref, w2c_ref, w2r_ref,
                           g1_ref, b1_ref, g2_ref, b2_ref, o_ref,
                           *, L, nl_valid, lane_pad, mxu_dtype):
    """Whole residual block on a VMEM-resident slab (single pallas_call):
    conv1 -> BN1(batch stats) -> ReLU -> conv2 -> BN2 -> +x -> ReLU."""
    x = x_ref[...]                                            # (Cp, T) f32
    T = x.shape[1]
    inv_count = 1.0 / float(nl_valid)
    if lane_pad:
        col = jax.lax.broadcasted_iota(jnp.int32, (1, T), 1)
        valid = (col < nl_valid).astype(jnp.float32)          # exclude padded lanes
    else:
        valid = None

    def batch_norm(h, g_ref, beta_ref):
        # Two-pass (mean, then centered variance) for accuracy; padded columns are
        # masked out and padded channel rows are self-consistently zero.
        hv = h * valid if lane_pad else h
        mean = jnp.sum(hv, axis=1, keepdims=True) * inv_count
        d = h - mean
        if lane_pad:
            d = d * valid
        var = jnp.sum(d * d, axis=1, keepdims=True) * inv_count
        scale = g_ref[...] * jax.lax.rsqrt(var + EPS)
        bias = beta_ref[...] - mean * scale
        return scale * h + bias

    h1 = _conv3_masked(x, L, w1l_ref, w1c_ref, w1r_ref, mxu_dtype)
    a2 = jnp.maximum(batch_norm(h1, g1_ref, b1_ref), 0.0)
    h2 = _conv3_masked(a2, L, w2l_ref, w2c_ref, w2r_ref, mxu_dtype)
    o_ref[...] = jnp.maximum(batch_norm(h2, g2_ref, b2_ref) + x, 0.0)


def _resblock_fused(x2, bw, *, L, nl_valid, cols, Cp, lane_pad, mxu_dtype, vmem_limit):
    kern = functools.partial(_resblock_fused_kernel, L=L, nl_valid=nl_valid,
                             lane_pad=lane_pad, mxu_dtype=mxu_dtype)
    full = lambda i: (0, 0)
    slab = pl.BlockSpec((Cp, cols), full)
    mat = pl.BlockSpec((Cp, Cp), full)
    vec = pl.BlockSpec((Cp, 1), full)
    flops = 12 * Cp * Cp * cols + 32 * Cp * cols
    return pl.pallas_call(
        kern,
        grid=(1,),
        in_specs=[slab, mat, mat, mat, mat, mat, mat, vec, vec, vec, vec],
        out_specs=slab,
        out_shape=jax.ShapeDtypeStruct((Cp, cols), jnp.float32),
        compiler_params=pltpu.CompilerParams(
            dimension_semantics=("arbitrary",), vmem_limit_bytes=vmem_limit),
        cost_estimate=pl.CostEstimate(
            flops=int(flops), transcendentals=int(2 * Cp),
            bytes_accessed=int(8 * Cp * cols + 12 * Cp * Cp + 16 * Cp)),
    )(x2, bw["w1l"], bw["w1c"], bw["w1r"], bw["w2l"], bw["w2c"], bw["w2r"],
      bw["g1"], bw["b1"], bw["g2"], bw["b2"])


# --------------------------------------------------------------- tiled fallback path
def _conv_stats_kernel(x_ref, wl_ref, wc_ref, wr_ref, scale_ref, bias_ref,
                       y_ref, sum_ref, sumsq_ref, *, L, pre_relu, mxu_dtype):
    """y = conv3(pre_relu(scale*x + bias)); accumulate per-channel sum / sumsq of y."""
    t = pl.program_id(0)

    @pl.when(t == 0)
    def _():
        sum_ref[...] = jnp.zeros_like(sum_ref)
        sumsq_ref[...] = jnp.zeros_like(sumsq_ref)

    a = scale_ref[...] * x_ref[...] + bias_ref[...]           # folded BN = one FMA
    if pre_relu:
        a = jnp.maximum(a, 0.0)
    y = _conv3_masked(a, L, wl_ref, wc_ref, wr_ref, mxu_dtype)
    y_ref[...] = y
    sum_ref[...] += jnp.sum(y, axis=1, keepdims=True)
    sumsq_ref[...] += jnp.sum(y * y, axis=1, keepdims=True)


def _conv_stats_res_kernel(h_ref, r_ref, wl_ref, wc_ref, wr_ref, scale_ref, bias_ref,
                           y_ref, xout_ref, sum_ref, sumsq_ref, *, L, mxu_dtype):
    """Previous block's BN2 + residual + ReLU fused into this block's conv1 pass.
    Writes the new residual slab once and the conv output + BN1 statistics."""
    t = pl.program_id(0)

    @pl.when(t == 0)
    def _():
        sum_ref[...] = jnp.zeros_like(sum_ref)
        sumsq_ref[...] = jnp.zeros_like(sumsq_ref)

    a = jnp.maximum(scale_ref[...] * h_ref[...] + bias_ref[...] + r_ref[...], 0.0)
    xout_ref[...] = a
    y = _conv3_masked(a, L, wl_ref, wc_ref, wr_ref, mxu_dtype)
    y_ref[...] = y
    sum_ref[...] += jnp.sum(y, axis=1, keepdims=True)
    sumsq_ref[...] += jnp.sum(y * y, axis=1, keepdims=True)


def _conv_stats(x2, wl, wc, wr, scale, bias, *, L, pre_relu, n_tiles, T, cols, Cp,
                mxu_dtype, vmem_limit):
    kern = functools.partial(_conv_stats_kernel, L=L, pre_relu=pre_relu,
                             mxu_dtype=mxu_dtype)
    flops = 6 * Cp * Cp * cols + 10 * Cp * cols
    return pl.pallas_call(
        kern,
        grid=(n_tiles,),
        in_specs=[pl.BlockSpec((Cp, T), lambda t: (0, t))]
                 + [pl.BlockSpec((Cp, Cp), lambda t: (0, 0))] * 3
                 + [pl.BlockSpec((Cp, 1), lambda t: (0, 0))] * 2,
        out_specs=[pl.BlockSpec((Cp, T), lambda t: (0, t)),
                   pl.BlockSpec((Cp, 1), lambda t: (0, 0)),
                   pl.BlockSpec((Cp, 1), lambda t: (0, 0))],
        out_shape=(jax.ShapeDtypeStruct((Cp, cols), jnp.float32),
                   jax.ShapeDtypeStruct((Cp, 1), jnp.float32),
                   jax.ShapeDtypeStruct((Cp, 1), jnp.float32)),
        compiler_params=pltpu.CompilerParams(
            dimension_semantics=("arbitrary",), vmem_limit_bytes=vmem_limit),
        cost_estimate=pl.CostEstimate(flops=int(flops), transcendentals=0,
                                      bytes_accessed=int(8 * Cp * cols + 6 * Cp * Cp)),
    )(x2, wl, wc, wr, scale, bias)


def _conv_stats_res(h2, res, wl, wc, wr, scale, bias, *, L, n_tiles, T, cols, Cp,
                    mxu_dtype, vmem_limit):
    kern = functools.partial(_conv_stats_res_kernel, L=L, mxu_dtype=mxu_dtype)
    return pl.pallas_call(
        kern,
        grid=(n_tiles,),
        in_specs=[pl.BlockSpec((Cp, T), lambda t: (0, t)),
                  pl.BlockSpec((Cp, T), lambda t: (0, t))]
                 + [pl.BlockSpec((Cp, Cp), lambda t: (0, 0))] * 3
                 + [pl.BlockSpec((Cp, 1), lambda t: (0, 0))] * 2,
        out_specs=[pl.BlockSpec((Cp, T), lambda t: (0, t)),
                   pl.BlockSpec((Cp, T), lambda t: (0, t)),
                   pl.BlockSpec((Cp, 1), lambda t: (0, 0)),
                   pl.BlockSpec((Cp, 1), lambda t: (0, 0))],
        out_shape=(jax.ShapeDtypeStruct((Cp, cols), jnp.float32),
                   jax.ShapeDtypeStruct((Cp, cols), jnp.float32),
                   jax.ShapeDtypeStruct((Cp, 1), jnp.float32),
                   jax.ShapeDtypeStruct((Cp, 1), jnp.float32)),
        compiler_params=pltpu.CompilerParams(
            dimension_semantics=("arbitrary",), vmem_limit_bytes=vmem_limit),
    )(h2, res, wl, wc, wr, scale, bias)


def _fold_bn(s, q, gamma, beta, count):
    """One-pass BN fold: var = E[y^2] - mean^2; apply becomes scale*y + bias."""
    mean = s / count
    var = jnp.maximum(q / count - mean * mean, 0.0)
    scale = gamma * jax.lax.rsqrt(var + EPS)
    bias = beta - mean * scale
    return scale, bias


# ---------------------------------------------------------------------- head convs
def _head_conv_plain_kernel(x_ref, w_ref, b_ref, o_ref):
    w = w_ref[...]
    o_ref[...] = (jnp.dot(w, x_ref[...].astype(w.dtype),
                          preferred_element_type=jnp.float32) + b_ref[...])


def _head_conv_res_kernel(h_ref, r_ref, scale_ref, bias_ref, w_ref, b_ref, o_ref):
    a = jnp.maximum(scale_ref[...] * h_ref[...] + bias_ref[...] + r_ref[...], 0.0)
    w = w_ref[...]
    o_ref[...] = (jnp.dot(w, a.astype(w.dtype),
                          preferred_element_type=jnp.float32) + b_ref[...])


def _head_conv_plain(x2, w_all, b_all, *, n_tiles, T, cols, Cp, vmem_limit):
    Rt = w_all.shape[0]
    return pl.pallas_call(
        _head_conv_plain_kernel,
        grid=(n_tiles,),
        in_specs=[pl.BlockSpec((Cp, T), lambda t: (0, t)),
                  pl.BlockSpec((Rt, Cp), lambda t: (0, 0)),
                  pl.BlockSpec((Rt, 1), lambda t: (0, 0))],
        out_specs=pl.BlockSpec((Rt, T), lambda t: (0, t)),
        out_shape=jax.ShapeDtypeStruct((Rt, cols), jnp.float32),
        compiler_params=pltpu.CompilerParams(
            dimension_semantics=("parallel",), vmem_limit_bytes=vmem_limit),
    )(x2, w_all, b_all)


def _head_conv_res(h2, res, scale, bias, w_all, b_all, *, n_tiles, T, cols, Cp,
                   vmem_limit):
    Rt = w_all.shape[0]
    return pl.pallas_call(
        _head_conv_res_kernel,
        grid=(n_tiles,),
        in_specs=[pl.BlockSpec((Cp, T), lambda t: (0, t)),
                  pl.BlockSpec((Cp, T), lambda t: (0, t)),
                  pl.BlockSpec((Cp, 1), lambda t: (0, 0)),
                  pl.BlockSpec((Cp, 1), lambda t: (0, 0)),
                  pl.BlockSpec((Rt, Cp), lambda t: (0, 0)),
                  pl.BlockSpec((Rt, 1), lambda t: (0, 0))],
        out_specs=pl.BlockSpec((Rt, T), lambda t: (0, t)),
        out_shape=jax.ShapeDtypeStruct((Rt, cols), jnp.float32),
        compiler_params=pltpu.CompilerParams(
            dimension_semantics=("parallel",), vmem_limit_bytes=vmem_limit),
    )(h2, res, scale, bias, w_all, b_all)


# ------------------------------------------------------------------- fused head MLPs
def _make_mlp_kernel(n_layers, final_act):
    def kernel(*refs):
        o_ref = refs[-1]
        y = refs[0][...]
        for i in range(n_layers):
            w = refs[1 + 2 * i][...]
            b = refs[2 + 2 * i][...]
            y = jnp.dot(y, w, preferred_element_type=jnp.float32) + b
            if i < n_layers - 1:
                y = jnp.where(y > 0.0, y, jnp.exp(jnp.minimum(y, 0.0)) - 1.0)   # ELU
            elif final_act == "sigmoid":
                y = 1.0 / (1.0 + jnp.exp(-y))
        o_ref[...] = y
    return kernel


def _mlp_head(y, ws, bs, *, final_act, vmem_limit):
    """All MLP layers of one head in a single fused kernel (tiny operands)."""
    n_layers = len(ws)
    kern = _make_mlp_kernel(n_layers, final_act)
    B = y.shape[0]
    full = lambda i: (0, 0)
    in_specs = [pl.BlockSpec(y.shape, full)]
    args = [y.astype(jnp.float32)]
    for W, b in zip(ws, bs):                 # W: (In, Out) f32, b: (1, Out) f32
        in_specs += [pl.BlockSpec(W.shape, full), pl.BlockSpec(b.shape, full)]
        args += [W, b]
    Out = ws[-1].shape[1]
    return pl.pallas_call(
        kern,
        grid=(1,),
        in_specs=in_specs,
        out_specs=pl.BlockSpec((B, Out), full),
        out_shape=jax.ShapeDtypeStruct((B, Out), jnp.float32),
        compiler_params=pltpu.CompilerParams(
            dimension_semantics=("arbitrary",), vmem_limit_bytes=vmem_limit),
    )(*args)


# -------------------------------------------------------------- parameter preparation
def prepare_params(params, *, mxu_dtype=jnp.bfloat16):
    """Pad / split / cast all weights ONCE (no per-forward layout glue)."""
    heads = (params["value"], params["policy"], params["choice"])
    C = heads[0]["cw"].shape[1]
    sub = 16 if mxu_dtype == jnp.bfloat16 else 8     # bf16 sublane packing
    Cp = max(sub, _round_up(C, sub))

    def pad_mat(m):                                   # (C, C) -> (Cp, Cp)
        return jnp.pad(m.astype(jnp.float32),
                       ((0, Cp - C), (0, Cp - C))).astype(mxu_dtype)

    def pad_vec(v):                                   # (C,) -> (Cp, 1)
        return jnp.pad(v.astype(jnp.float32), (0, Cp - v.shape[0])).reshape(Cp, 1)

    blocks = []
    for bp in params["blocks"]:
        blocks.append(dict(
            w1l=pad_mat(bp["w1"][:, :, 0]), w1c=pad_mat(bp["w1"][:, :, 1]),
            w1r=pad_mat(bp["w1"][:, :, 2]),
            w2l=pad_mat(bp["w2"][:, :, 0]), w2c=pad_mat(bp["w2"][:, :, 1]),
            w2r=pad_mat(bp["w2"][:, :, 2]),
            g1=pad_vec(bp["g1"]), b1=pad_vec(bp["b1"]),
            g2=pad_vec(bp["g2"]), b2=pad_vec(bp["b2"])))

    w_all = jnp.concatenate(
        [jnp.pad(h["cw"].astype(jnp.float32), ((0, 0), (0, Cp - C))) for h in heads],
        axis=0).astype(mxu_dtype)
    b_all = jnp.concatenate(
        [h["cb"].astype(jnp.float32) for h in heads]).reshape(-1, 1)

    mlps = []
    for h in heads:
        mlps.append(dict(
            w=[jnp.transpose(W).astype(jnp.float32) for W in h["mlp_w"]],
            b=[b.reshape(1, -1).astype(jnp.float32) for b in h["mlp_b"]]))

    arrays = dict(blocks=blocks, w_all=w_all, b_all=b_all, mlps=mlps)
    meta = dict(C=C, Cp=Cp, mxu_dtype=mxu_dtype,
                head_R=tuple(int(h["cw"].shape[0]) for h in heads),
                head_act=("sigmoid", "none", "none"))
    return arrays, meta


# ----------------------------------------------------------------- network forward
def prediction_network_forward(x, arrays, *, meta):
    """x: (N, C, L) float32.  Returns (policy, value, choice)."""
    C, Cp = meta["C"], meta["Cp"]
    mxu_dtype = meta["mxu_dtype"]
    N, _, L = x.shape
    NL = N * L
    blocks = arrays["blocks"]

    vmem_cap = _tpu_vmem_capacity()
    vmem_limit = max(32 << 20, min((vmem_cap * 3) // 4, vmem_cap - (8 << 20)))

    # Single entry transpose to channels-major; never transposed back.
    x2 = jnp.transpose(x.astype(jnp.float32), (1, 0, 2)).reshape(C, NL)
    x2 = jnp.pad(x2, ((0, Cp - C), (0, 0)))

    NLp = _round_up(NL, 128)                    # lane-dense (unmasked store) width
    use_fused = Cp * NLp * 4 <= vmem_cap // 24  # whole slab + intermediates fit VMEM

    if use_fused:
        # ---- small-slab fast path: one pallas_call per residual block ----
        if NLp != NL:
            x2 = jnp.pad(x2, ((0, 0), (0, NLp - NL)))
        cur = x2
        for bw in blocks:
            cur = _resblock_fused(cur, bw, L=L, nl_valid=NL, cols=NLp, Cp=Cp,
                                  lane_pad=(NLp != NL), mxu_dtype=mxu_dtype,
                                  vmem_limit=vmem_limit)
        y_all = _head_conv_plain(cur, arrays["w_all"], arrays["b_all"],
                                 n_tiles=1, T=NLp, cols=NLp, Cp=Cp,
                                 vmem_limit=vmem_limit)
    else:
        # ---- tiled fallback: cross-tile BN accumulators; each block's
        #      BN2+residual+ReLU is folded into the NEXT conv pass / head conv ----
        tile_n = _pick_tile_n(N, L, Cp, vmem_limit // 10)
        n_tiles = N // tile_n
        T = tile_n * L
        count = float(NL)
        ones_c = jnp.ones((Cp, 1), jnp.float32)
        zeros_c = jnp.zeros((Cp, 1), jnp.float32)

        res = x2                    # residual input of the current block
        h_prev = None               # conv2 output of the previous block
        sc_p = bi_p = None          # folded BN2 of the previous block
        for i, bw in enumerate(blocks):
            if i == 0:
                h1, s1, q1 = _conv_stats(
                    res, bw["w1l"], bw["w1c"], bw["w1r"], ones_c, zeros_c,
                    L=L, pre_relu=False, n_tiles=n_tiles, T=T, cols=NL, Cp=Cp,
                    mxu_dtype=mxu_dtype, vmem_limit=vmem_limit)
            else:
                h1, res, s1, q1 = _conv_stats_res(
                    h_prev, res, bw["w1l"], bw["w1c"], bw["w1r"], sc_p, bi_p,
                    L=L, n_tiles=n_tiles, T=T, cols=NL, Cp=Cp,
                    mxu_dtype=mxu_dtype, vmem_limit=vmem_limit)
            sc1, bi1 = _fold_bn(s1, q1, bw["g1"], bw["b1"], count)
            h2, s2, q2 = _conv_stats(
                h1, bw["w2l"], bw["w2c"], bw["w2r"], sc1, bi1,
                L=L, pre_relu=True, n_tiles=n_tiles, T=T, cols=NL, Cp=Cp,
                mxu_dtype=mxu_dtype, vmem_limit=vmem_limit)
            sc_p, bi_p = _fold_bn(s2, q2, bw["g2"], bw["b2"], count)
            h_prev = h2

        if blocks:
            y_all = _head_conv_res(h_prev, res, sc_p, bi_p,
                                   arrays["w_all"], arrays["b_all"],
                                   n_tiles=n_tiles, T=T, cols=NL, Cp=Cp,
                                   vmem_limit=vmem_limit)
        else:
            y_all = _head_conv_plain(res, arrays["w_all"], arrays["b_all"],
                                     n_tiles=n_tiles, T=T, cols=NL, Cp=Cp,
                                     vmem_limit=vmem_limit)

    y_all = y_all[:, :NL]                        # drop lane padding (if any)

    outs = []
    off = 0
    for R, act, mlp in zip(meta["head_R"], meta["head_act"], arrays["mlps"]):
        y = y_all[off:off + R]
        off += R
        # torch .view(-1, R*L): (N, R, L) row-major flatten — tiny XLA layout glue
        y = jnp.transpose(y.reshape(R, N, L), (1, 0, 2)).reshape(N, R * L)
        y = _mlp_head(y, mlp["w"], mlp["b"], final_act=act, vmem_limit=vmem_limit)
        outs.append(y)
    value, policy, choice = outs
    return policy, value, choice


# ---------------------------------------------------------------- pure-JAX reference
def prediction_network_reference(x, params):
    x = x.astype(jnp.float32)
    N, C, L = x.shape

    def conv3_ref(a, w):
        return jax.lax.conv_general_dilated(
            a, w, window_strides=(1,), padding=((1, 1),),
            dimension_numbers=("NCH", "OIH", "NCH"))

    def bn_ref(a, g, b):
        mean = jnp.mean(a, axis=(0, 2), keepdims=True)
        var = jnp.mean((a - mean) ** 2, axis=(0, 2), keepdims=True)
        return (g.reshape(1, -1, 1) * (a - mean) * jax.lax.rsqrt(var + EPS)
                + b.reshape(1, -1, 1))

    h = x
    for bp in params["blocks"]:
        r = h
        h = jax.nn.relu(bn_ref(conv3_ref(h, bp["w1"]), bp["g1"], bp["b1"]))
        h = bn_ref(conv3_ref(h, bp["w2"]), bp["g2"], bp["b2"])
        h = jax.nn.relu(h + r)

    def head(hp, out_act):
        y = jnp.einsum("ncl,rc->nrl", h, hp["cw"]) + hp["cb"].reshape(1, -1, 1)
        y = y.reshape(N, -1)
        n = len(hp["mlp_w"])
        for i, (W, b) in enumerate(zip(hp["mlp_w"], hp["mlp_b"])):
            y = y @ W.T + b
            if i < n - 1:
                y = jax.nn.elu(y)
            elif out_act == "sigmoid":
                y = jax.nn.sigmoid(y)
        return y

    value = head(params["value"], "sigmoid")
    policy = head(params["policy"], "none")
    choice = head(params["choice"], "none")
    return policy, value, choice


# -------------------------------------------------------------------- param builder
def _mlp_params(key, in_size, layer_sizes, out_size):
    sizes = [in_size] + list(layer_sizes) + [out_size]
    ws, bs = [], []
    for i in range(len(sizes) - 1):
        key, kw, kb = jax.random.split(key, 3)
        bound = 1.0 / (sizes[i] ** 0.5)
        ws.append(jax.random.uniform(kw, (sizes[i + 1], sizes[i]), jnp.float32,
                                     -bound, bound))
        bs.append(jax.random.uniform(kb, (sizes[i + 1],), jnp.float32, -bound, bound))
    return ws, bs


def init_params(key, *, num_blocks, num_channels, length, action_space_size, num_choice,
                rc_value, rc_policy, rc_choice,
                fc_value_layers, fc_policy_layers, fc_choice_layers):
    C, L = num_channels, length

    def conv3_w(k):
        bound = 1.0 / (3.0 * C) ** 0.5
        return jax.random.uniform(k, (C, C, 3), jnp.float32, -bound, bound)

    def bn_p(k):
        kg, kb = jax.random.split(k)
        return (1.0 + 0.1 * jax.random.normal(kg, (C,), jnp.float32),
                0.1 * jax.random.normal(kb, (C,), jnp.float32))

    blocks = []
    for i in range(num_blocks):
        kblk = jax.random.fold_in(key, i)
        k1, k2, k3, k4 = jax.random.split(kblk, 4)
        g1, b1 = bn_p(k3)
        g2, b2 = bn_p(k4)
        blocks.append(dict(w1=conv3_w(k1), g1=g1, b1=b1, w2=conv3_w(k2), g2=g2, b2=b2))

    def head_p(k, rc, fc_layers, out_size):
        k1, k2, k3 = jax.random.split(k, 3)
        bound = 1.0 / C ** 0.5
        cw = jax.random.uniform(k1, (rc, C), jnp.float32, -bound, bound)
        cb = jax.random.uniform(k2, (rc,), jnp.float32, -bound, bound)
        ws, bs = _mlp_params(k3, rc * L, fc_layers, out_size)
        return dict(cw=cw, cb=cb, mlp_w=ws, mlp_b=bs)

    return dict(
        blocks=blocks,
        value=head_p(jax.random.fold_in(key, 101), rc_value, fc_value_layers, 1),
        policy=head_p(jax.random.fold_in(key, 102), rc_policy, fc_policy_layers,
                      action_space_size),
        choice=head_p(jax.random.fold_in(key, 103), rc_choice, fc_choice_layers,
                      num_choice),
    )


# -------------------------------------------------------------------------- main
if __name__ == "__main__":
    N, C, L = 2, 8, 16
    action_space_size, num_choice = 6, 3
    num_blocks = 2
    rc_value, rc_policy, rc_choice = 2, 4, 2
    fc_value_layers, fc_policy_layers, fc_choice_layers = [32], [32], [32]

    key = jax.random.PRNGKey(0)
    kx, kp = jax.random.split(key)
    x = jax.random.normal(kx, (N, C, L), dtype=jnp.float32)
    params = init_params(
        kp, num_blocks=num_blocks, num_channels=C, length=L,
        action_space_size=action_space_size, num_choice=num_choice,
        rc_value=rc_value, rc_policy=rc_policy, rc_choice=rc_choice,
        fc_value_layers=fc_value_layers, fc_policy_layers=fc_policy_layers,
        fc_choice_layers=fc_choice_layers)

    arrays, meta = prepare_params(params)                 # one-time weight prep
    fwd = jax.jit(functools.partial(prediction_network_forward, meta=meta))

    policy, value, choice = jax.block_until_ready(fwd(x, arrays))
    policy_r, value_r, choice_r = jax.block_until_ready(
        prediction_network_reference(x, params))

    assert policy.shape == (N, action_space_size) and policy.dtype == jnp.float32
    assert value.shape == (N, 1) and value.dtype == jnp.float32
    assert choice.shape == (N, num_choice) and choice.dtype == jnp.float32

    # bf16 MXU matmuls in the trunk -> relaxed tolerance (stats/residual stay f32)
    for got, ref, name in ((policy, policy_r, "policy"), (value, value_r, "value"),
                           (choice, choice_r, "choice")):
        err = float(jnp.max(jnp.abs(got - ref)))
        assert jnp.allclose(got, ref, atol=5e-2, rtol=5e-2), f"{name} max abs err {err}"

    print("KERNEL_OK")
</pallas_src>

<mosaic_0001>
module attributes {stable_mosaic.version = 11 : i64} {
  func.func @_head_conv_plain_kernel(%arg0: i32, %arg1: memref<16x128xf32, #tpu.memory_space<vmem>>, %arg2: memref<8x16xbf16, #tpu.memory_space<vmem>>, %arg3: memref<8x1xf32, #tpu.memory_space<vmem>>, %arg4: memref<8x128xf32, #tpu.memory_space<vmem>>) attributes {dimension_semantics = [#tpu.dimension_semantics<parallel>], iteration_bounds = array<i64: 1>, scalar_prefetch = 0 : i64, scratch_operands = 0 : i64, tpu.core_type = #tpu.core_type<tc>, window_params = [{transform_indices = @transform_0, window_bounds = array<i64: 16, 128>}, {pipeline_mode = #tpu.pipeline_mode<synchronous>, transform_indices = @transform_1, window_bounds = array<i64: 8, 16>}, {pipeline_mode = #tpu.pipeline_mode<synchronous>, transform_indices = @transform_2, window_bounds = array<i64: 8, 1>}, {transform_indices = @transform_3, window_bounds = array<i64: 8, 128>}]} {
    %c0 = arith.constant 0 : index
    %c0_0 = arith.constant 0 : index
    %0 = vector.load %arg2[%c0, %c0_0] : memref<8x16xbf16, #tpu.memory_space<vmem>>, vector<8x16xbf16>
    %c0_1 = arith.constant 0 : index
    %c0_2 = arith.constant 0 : index
    %1 = vector.load %arg1[%c0_1, %c0_2] : memref<16x128xf32, #tpu.memory_space<vmem>>, vector<16x128xf32>
    %2 = arith.truncf %1 : vector<16x128xf32> to vector<16x128xbf16>
    %cst = arith.constant dense<0.000000e+00> : vector<8x128xf32>
    %3 = tpu.matmul %0, %2, %cst {dimension_numbers = #tpu.dot_dimension_numbers<[1], [0], [0], [1], [0, 0, 1, 1], [], []>} : vector<8x16xbf16>, vector<16x128xbf16>, vector<8x128xf32> -> vector<8x128xf32>
    %c0_3 = arith.constant 0 : index
    %c0_4 = arith.constant 0 : index
    %4 = vector.load %arg3[%c0_3, %c0_4] : memref<8x1xf32, #tpu.memory_space<vmem>>, vector<8x1xf32>
    %5 = vector.broadcast %4 : vector<8x1xf32> to vector<8x128xf32>
    %6 = arith.addf %3, %5 : vector<8x128xf32>
    %c0_5 = arith.constant 0 : index
    %c0_6 = arith.constant 0 : index
    %7 = vector.load %arg4[%c0_5, %c0_6] : memref<8x128xf32, #tpu.memory_space<vmem>>, vector<8x128xf32>
    tpu.vector_store %arg4[%c0_5, %c0_6], %6 {strides = array<i32>} : memref<8x128xf32, #tpu.memory_space<vmem>>, vector<8x128xf32>,
    return
  }
  func.func @transform_0(%arg0: i32) -> (i32, i32) {
    %c0_i32 = arith.constant 0 : i32
    %c0_i32_0 = arith.constant 0 : i32
    return %c0_i32, %arg0 : i32, i32
  }
  func.func @transform_1(%arg0: i32) -> (i32, i32) {
    %c0_i32 = arith.constant 0 : i32
    %c0_i32_0 = arith.constant 0 : i32
    %c0_i32_1 = arith.constant 0 : i32
    return %c0_i32, %c0_i32_0 : i32, i32
  }
  func.func @transform_2(%arg0: i32) -> (i32, i32) {
    %c0_i32 = arith.constant 0 : i32
    %c0_i32_0 = arith.constant 0 : i32
    %c0_i32_1 = arith.constant 0 : i32
    return %c0_i32, %c0_i32_0 : i32, i32
  }
  func.func @transform_3(%arg0: i32) -> (i32, i32) {
    %c0_i32 = arith.constant 0 : i32
    %c0_i32_0 = arith.constant 0 : i32
    return %c0_i32, %arg0 : i32, i32
  }
}

module attributes {stable_mosaic.version = 11 : i64} {
  func.func @_resblock_fused_kernel(%arg0: i32, %arg1: memref<16x128xf32, #tpu.memory_space<vmem>>, %arg2: memref<16x16xbf16, #tpu.memory_space<vmem>>, %arg3: memref<16x16xbf16, #tpu.memory_space<vmem>>, %arg4: memref<16x16xbf16, #tpu.memory_space<vmem>>, %arg5: memref<16x16xbf16, #tpu.memory_space<vmem>>, %arg6: memref<16x16xbf16, #tpu.memory_space<vmem>>, %arg7: memref<16x16xbf16, #tpu.memory_space<vmem>>, %arg8: memref<16x1xf32, #tpu.memory_space<vmem>>, %arg9: memref<16x1xf32, #tpu.memory_space<vmem>>, %arg10: memref<16x1xf32, #tpu.memory_space<vmem>>, %arg11: memref<16x1xf32, #tpu.memory_space<vmem>>, %arg12: memref<16x128xf32, #tpu.memory_space<vmem>>) attributes {dimension_semantics = [#tpu.dimension_semantics<arbitrary>], iteration_bounds = array<i64: 1>, scalar_prefetch = 0 : i64, scratch_operands = 0 : i64, tpu.core_type = #tpu.core_type<tc>, window_params = [{pipeline_mode = #tpu.pipeline_mode<synchronous>, transform_indices = @transform_0, window_bounds = array<i64: 16, 128>}, {pipeline_mode = #tpu.pipeline_mode<synchronous>, transform_indices = @transform_1, window_bounds = array<i64: 16, 16>}, {pipeline_mode = #tpu.pipeline_mode<synchronous>, transform_indices = @transform_2, window_bounds = array<i64: 16, 16>}, {pipeline_mode = #tpu.pipeline_mode<synchronous>, transform_indices = @transform_3, window_bounds = array<i64: 16, 16>}, {pipeline_mode = #tpu.pipeline_mode<synchronous>, transform_indices = @transform_4, window_bounds = array<i64: 16, 16>}, {pipeline_mode = #tpu.pipeline_mode<synchronous>, transform_indices = @transform_5, window_bounds = array<i64: 16, 16>}, {pipeline_mode = #tpu.pipeline_mode<synchronous>, transform_indices = @transform_6, window_bounds = array<i64: 16, 16>}, {pipeline_mode = #tpu.pipeline_mode<synchronous>, transform_indices = @transform_7, window_bounds = array<i64: 16, 1>}, {pipeline_mode = #tpu.pipeline_mode<synchronous>, transform_indices = @transform_8, window_bounds = array<i64: 16, 1>}, {pipeline_mode = #tpu.pipeline_mode<synchronous>, transform_indices = @transform_9, window_bounds = array<i64: 16, 1>}, {pipeline_mode = #tpu.pipeline_mode<synchronous>, transform_indices = @transform_10, window_bounds = array<i64: 16, 1>}, {pipeline_mode = #tpu.pipeline_mode<synchronous>, transform_indices = @transform_11, window_bounds = array<i64: 16, 128>}]} {
    %c0 = arith.constant 0 : index
    %c0_0 = arith.constant 0 : index
    %0 = vector.load %arg1[%c0, %c0_0] : memref<16x128xf32, #tpu.memory_space<vmem>>, vector<16x128xf32>
    %1 = tpu.iota {dimensions = array<i32: 1>} : vector<1x128xi32>
    %c32_i32 = arith.constant 32 : i32
    %2 = vector.broadcast %c32_i32 : i32 to vector<1x128xi32>
    %3 = arith.cmpi slt, %1, %2 : vector<1x128xi32>
    %4 = arith.extui %3 : vector<1x128xi1> to vector<1x128xi32>
    %5 = arith.sitofp %4 : vector<1x128xi32> to vector<1x128xf32>
    %6 = tpu.iota {dimensions = array<i32: 1>} : vector<1x128xi32>
    %c16_i32 = arith.constant 16 : i32
    %c0_i32 = arith.constant 0 : i32
    %7 = arith.cmpi eq, %c16_i32, %c0_i32 : i32
    %c1_i32 = arith.constant 1 : i32
    %8 = arith.select %7, %c1_i32, %c16_i32 : i32
    %9 = vector.broadcast %8 : i32 to vector<1x128xi32>
    %10 = arith.remsi %6, %9 : vector<1x128xi32>
    %c0_i32_1 = arith.constant 0 : i32
    %11 = vector.broadcast %c0_i32_1 : i32 to vector<1x128xi32>
    %12 = arith.cmpi ne, %10, %11 : vector<1x128xi32>
    %c0_i32_2 = arith.constant 0 : i32
    %13 = vector.broadcast %c0_i32_2 : i32 to vector<1x128xi32>
    %14 = arith.cmpi slt, %10, %13 : vector<1x128xi32>
    %c0_i32_3 = arith.constant 0 : i32
    %15 = arith.cmpi slt, %8, %c0_i32_3 : i32
    %16 = vector.broadcast %15 : i1 to vector<1x128xi1>
    %17 = vector.broadcast %16 : vector<1x128xi1> to vector<1x128xi1>
    %18 = arith.xori %14, %17 : vector<1x128xi1>
    %19 = arith.andi %18, %12 : vector<1x128xi1>
    %20 = vector.broadcast %8 : i32 to vector<1x128xi32>
    %21 = arith.addi %10, %20 : vector<1x128xi32>
    %22 = arith.select %19, %21, %10 : vector<1x128xi1>, vector<1x128xi32>
    %c1_i32_4 = arith.constant 1 : i32
    %23 = vector.broadcast %c1_i32_4 : i32 to vector<1x128xi32>
    %24 = arith.cmpi sge, %22, %23 : vector<1x128xi32>
    %25 = arith.extui %24 : vector<1x128xi1> to vector<1x128xi32>
    %26 = arith.sitofp %25 : vector<1x128xi32> to vector<1x128xf32>
    %c14_i32 = arith.constant 14 : i32
    %27 = vector.broadcast %c14_i32 : i32 to vector<1x128xi32>
    %28 = arith.cmpi sle, %22, %27 : vector<1x128xi32>
    %29 = arith.extui %28 : vector<1x128xi1> to vector<1x128xi32>
    %30 = arith.sitofp %29 : vector<1x128xi32> to vector<1x128xf32>
    %c1_i32_5 = arith.constant 1 : i32
    %31 = tpu.dynamic_rotate %0 by %c1_i32_5 dim 1 : vector<16x128xf32>, i32 -> vector<16x128xf32>
    %32 = vector.broadcast %26 : vector<1x128xf32> to vector<16x128xf32>
    %33 = arith.mulf %31, %32 : vector<16x128xf32>
    %c127_i32 = arith.constant 127 : i32
    %34 = tpu.dynamic_rotate %0 by %c127_i32 dim 1 : vector<16x128xf32>, i32 -> vector<16x128xf32>
    %35 = vector.broadcast %30 : vector<1x128xf32> to vector<16x128xf32>
    %36 = arith.mulf %34, %35 : vector<16x128xf32>
    %c0_6 = arith.constant 0 : index
    %c0_7 = arith.constant 0 : index
    %37 = vector.load %arg3[%c0_6, %c0_7] : memref<16x16xbf16, #tpu.memory_space<vmem>>, vector<16x16xbf16>
    %38 = arith.truncf %0 : vector<16x128xf32> to vector<16x128xbf16>
    %cst = arith.constant dense<0.000000e+00> : vector<16x128xf32>
    %39 = tpu.matmul %37, %38, %cst {dimension_numbers = #tpu.dot_dimension_numbers<[1], [0], [0], [1], [0, 0, 1, 1], [], []>} : vector<16x16xbf16>, vector<16x128xbf16>, vector<16x128xf32> -> vector<16x128xf32>
    %c0_8 = arith.constant 0 : index
    %c0_9 = arith.constant 0 : index
    %40 = vector.load %arg2[%c0_8, %c0_9] : memref<16x16xbf16, #tpu.memory_space<vmem>>, vector<16x16xbf16>
    %41 = arith.truncf %33 : vector<16x128xf32> to vector<16x128xbf16>
    %cst_10 = arith.constant dense<0.000000e+00> : vector<16x128xf32>
    %42 = tpu.matmul %40, %41, %cst_10 {dimension_numbers = #tpu.dot_dimension_numbers<[1], [0], [0], [1], [0, 0, 1, 1], [], []>} : vector<16x16xbf16>, vector<16x128xbf16>, vector<16x128xf32> -> vector<16x128xf32>
    %43 = arith.addf %39, %42 : vector<16x128xf32>
    %c0_11 = arith.constant 0 : index
    %c0_12 = arith.constant 0 : index
    %44 = vector.load %arg4[%c0_11, %c0_12] : memref<16x16xbf16, #tpu.memory_space<vmem>>, vector<16x16xbf16>
    %45 = arith.truncf %36 : vector<16x128xf32> to vector<16x128xbf16>
    %cst_13 = arith.constant dense<0.000000e+00> : vector<16x128xf32>
    %46 = tpu.matmul %44, %45, %cst_13 {dimension_numbers = #tpu.dot_dimension_numbers<[1], [0], [0], [1], [0, 0, 1, 1], [], []>} : vector<16x16xbf16>, vector<16x128xbf16>, vector<16x128xf32> -> vector<16x128xf32>
    %47 = arith.addf %43, %46 : vector<16x128xf32>
    %48 = vector.broadcast %5 : vector<1x128xf32> to vector<16x128xf32>
    %49 = arith.mulf %47, %48 : vector<16x128xf32>
    %cst_14 = arith.constant dense<0.000000e+00> : vector<16xf32>
    %50 = vector.multi_reduction <add>, %49, %cst_14 [1] : vector<16x128xf32> to vector<16xf32>
    %51 = vector.shape_cast %50 : vector<16xf32> to vector<16x1xf32>
    %cst_15 = arith.constant 3.125000e-02 : f32
    %52 = vector.broadcast %cst_15 : f32 to vector<16x1xf32>
    %53 = arith.mulf %51, %52 : vector<16x1xf32>
    %54 = vector.broadcast %53 : vector<16x1xf32> to vector<16x128xf32>
    %55 = arith.subf %47, %54 : vector<16x128xf32>
    %56 = vector.broadcast %5 : vector<1x128xf32> to vector<16x128xf32>
    %57 = arith.mulf %55, %56 : vector<16x128xf32>
    %58 = arith.mulf %57, %57 : vector<16x128xf32>
    %cst_16 = arith.constant dense<0.000000e+00> : vector<16xf32>
    %59 = vector.multi_reduction <add>, %58, %cst_16 [1] : vector<16x128xf32> to vector<16xf32>
    %60 = vector.shape_cast %59 : vector<16xf32> to vector<16x1xf32>
    %cst_17 = arith.constant 3.125000e-02 : f32
    %61 = vector.broadcast %cst_17 : f32 to vector<16x1xf32>
    %62 = arith.mulf %60, %61 : vector<16x1xf32>
    %c0_18 = arith.constant 0 : index
    %c0_19 = arith.constant 0 : index
    %63 = vector.load %arg8[%c0_18, %c0_19] : memref<16x1xf32, #tpu.memory_space<vmem>>, vector<16x1xf32>
    %cst_20 = arith.constant 9.99999974E-6 : f32
    %64 = vector.broadcast %cst_20 : f32 to vector<16x1xf32>
    %65 = arith.addf %62, %64 : vector<16x1xf32>
    %66 = math.rsqrt %65 : vector<16x1xf32>
    %67 = arith.mulf %63, %66 : vector<16x1xf32>
    %c0_21 = arith.constant 0 : index
    %c0_22 = arith.constant 0 : index
    %68 = vector.load %arg9[%c0_21, %c0_22] : memref<16x1xf32, #tpu.memory_space<vmem>>, vector<16x1xf32>
    %69 = arith.mulf %53, %67 : vector<16x1xf32>
    %70 = arith.subf %68, %69 : vector<16x1xf32>
    %71 = vector.broadcast %67 : vector<16x1xf32> to vector<16x128xf32>
    %72 = arith.mulf %71, %47 : vector<16x128xf32>
    %73 = vector.broadcast %70 : vector<16x1xf32> to vector<16x128xf32>
    %74 = arith.addf %72, %73 : vector<16x128xf32>
    %cst_23 = arith.constant 0.000000e+00 : f32
    %75 = vector.broadcast %cst_23 : f32 to vector<16x128xf32>
    %76 = arith.maximumf %74, %75 : vector<16x128xf32>
    %77 = tpu.iota {dimensions = array<i32: 1>} : vector<1x128xi32>
    %c16_i32_24 = arith.constant 16 : i32
    %c0_i32_25 = arith.constant 0 : i32
    %78 = arith.cmpi eq, %c16_i32_24, %c0_i32_25 : i32
    %c1_i32_26 = arith.constant 1 : i32
    %79 = arith.select %78, %c1_i32_26, %c16_i32_24 : i32
    %80 = vector.broadcast %79 : i32 to vector<1x128xi32>
    %81 = arith.remsi %77, %80 : vector<1x128xi32>
    %c0_i32_27 = arith.constant 0 : i32
    %82 = vector.broadcast %c0_i32_27 : i32 to vector<1x128xi32>
    %83 = arith.cmpi ne, %81, %82 : vector<1x128xi32>
    %c0_i32_28 = arith.constant 0 : i32
    %84 = vector.broadcast %c0_i32_28 : i32 to vector<1x128xi32>
    %85 = arith.cmpi slt, %81, %84 : vector<1x128xi32>
    %c0_i32_29 = arith.constant 0 : i32
    %86 = arith.cmpi slt, %79, %c0_i32_29 : i32
    %87 = vector.broadcast %86 : i1 to vector<1x128xi1>
    %88 = vector.broadcast %87 : vector<1x128xi1> to vector<1x128xi1>
    %89 = arith.xori %85, %88 : vector<1x128xi1>
    %90 = arith.andi %89, %83 : vector<1x128xi1>
    %91 = vector.broadcast %79 : i32 to vector<1x128xi32>
    %92 = arith.addi %81, %91 : vector<1x128xi32>
    %93 = arith.select %90, %92, %81 : vector<1x128xi1>, vector<1x128xi32>
    %c1_i32_30 = arith.constant 1 : i32
    %94 = vector.broadcast %c1_i32_30 : i32 to vector<1x128xi32>
    %95 = arith.cmpi sge, %93, %94 : vector<1x128xi32>
    %96 = arith.extui %95 : vector<1x128xi1> to vector<1x128xi32>
    %97 = arith.sitofp %96 : vector<1x128xi32> to vector<1x128xf32>
    %c14_i32_31 = arith.constant 14 : i32
    %98 = vector.broadcast %c14_i32_31 : i32 to vector<1x128xi32>
    %99 = arith.cmpi sle, %93, %98 : vector<1x128xi32>
    %100 = arith.extui %99 : vector<1x128xi1> to vector<1x128xi32>
    %101 = arith.sitofp %100 : vector<1x128xi32> to vector<1x128xf32>
    %c1_i32_32 = arith.constant 1 : i32
    %102 = tpu.dynamic_rotate %76 by %c1_i32_32 dim 1 : vector<16x128xf32>, i32 -> vector<16x128xf32>
    %103 = vector.broadcast %97 : vector<1x128xf32> to vector<16x128xf32>
    %104 = arith.mulf %102, %103 : vector<16x128xf32>
    %c127_i32_33 = arith.constant 127 : i32
    %105 = tpu.dynamic_rotate %76 by %c127_i32_33 dim 1 : vector<16x128xf32>, i32 -> vector<16x128xf32>
    %106 = vector.broadcast %101 : vector<1x128xf32> to vector<16x128xf32>
    %107 = arith.mulf %105, %106 : vector<16x128xf32>
    %c0_34 = arith.constant 0 : index
    %c0_35 = arith.constant 0 : index
    %108 = vector.load %arg6[%c0_34, %c0_35] : memref<16x16xbf16, #tpu.memory_space<vmem>>, vector<16x16xbf16>
    %109 = arith.truncf %76 : vector<16x128xf32> to vector<16x128xbf16>
    %cst_36 = arith.constant dense<0.000000e+00> : vector<16x128xf32>
    %110 = tpu.matmul %108, %109, %cst_36 {dimension_numbers = #tpu.dot_dimension_numbers<[1], [0], [0], [1], [0, 0, 1, 1], [], []>} : vector<16x16xbf16>, vector<16x128xbf16>, vector<16x128xf32> -> vector<16x128xf32>
    %c0_37 = arith.constant 0 : index
    %c0_38 = arith.constant 0 : index
    %111 = vector.load %arg5[%c0_37, %c0_38] : memref<16x16xbf16, #tpu.memory_space<vmem>>, vector<16x16xbf16>
    %112 = arith.truncf %104 : vector<16x128xf32> to vector<16x128xbf16>
    %cst_39 = arith.constant dense<0.000000e+00> : vector<16x128xf32>
    %113 = tpu.matmul %111, %112, %cst_39 {dimension_numbers = #tpu.dot_dimension_numbers<[1], [0], [0], [1], [0, 0, 1, 1], [], []>} : vector<16x16xbf16>, vector<16x128xbf16>, vector<16x128xf32> -> vector<16x128xf32>
    %114 = arith.addf %110, %113 : vector<16x128xf32>
    %c0_40 = arith.constant 0 : index
    %c0_41 = arith.constant 0 : index
    %115 = vector.load %arg7[%c0_40, %c0_41] : memref<16x16xbf16, #tpu.memory_space<vmem>>, vector<16x16xbf16>
    %116 = arith.truncf %107 : vector<16x128xf32> to vector<16x128xbf16>
    %cst_42 = arith.constant dense<0.000000e+00> : vector<16x128xf32>
    %117 = tpu.matmul %115, %116, %cst_42 {dimension_numbers = #tpu.dot_dimension_numbers<[1], [0], [0], [1], [0, 0, 1, 1], [], []>} : vector<16x16xbf16>, vector<16x128xbf16>, vector<16x128xf32> -> vector<16x128xf32>
    %118 = arith.addf %114, %117 : vector<16x128xf32>
    %119 = vector.broadcast %5 : vector<1x128xf32> to vector<16x128xf32>
    %120 = arith.mulf %118, %119 : vector<16x128xf32>
    %cst_43 = arith.constant dense<0.000000e+00> : vector<16xf32>
    %121 = vector.multi_reduction <add>, %120, %cst_43 [1] : vector<16x128xf32> to vector<16xf32>
    %122 = vector.shape_cast %121 : vector<16xf32> to vector<16x1xf32>
    %cst_44 = arith.constant 3.125000e-02 : f32
    %123 = vector.broadcast %cst_44 : f32 to vector<16x1xf32>
    %124 = arith.mulf %122, %123 : vector<16x1xf32>
    %125 = vector.broadcast %124 : vector<16x1xf32> to vector<16x128xf32>
    %126 = arith.subf %118, %125 : vector<16x128xf32>
    %127 = vector.broadcast %5 : vector<1x128xf32> to vector<16x128xf32>
    %128 = arith.mulf %126, %127 : vector<16x128xf32>
    %129 = arith.mulf %128, %128 : vector<16x128xf32>
    %cst_45 = arith.constant dense<0.000000e+00> : vector<16xf32>
    %130 = vector.multi_reduction <add>, %129, %cst_45 [1] : vector<16x128xf32> to vector<16xf32>
    %131 = vector.shape_cast %130 : vector<16xf32> to vector<16x1xf32>
    %cst_46 = arith.constant 3.125000e-02 : f32
    %132 = vector.broadcast %cst_46 : f32 to vector<16x1xf32>
    %133 = arith.mulf %131, %132 : vector<16x1xf32>
    %c0_47 = arith.constant 0 : index
    %c0_48 = arith.constant 0 : index
    %134 = vector.load %arg10[%c0_47, %c0_48] : memref<16x1xf32, #tpu.memory_space<vmem>>, vector<16x1xf32>
    %cst_49 = arith.constant 9.99999974E-6 : f32
    %135 = vector.broadcast %cst_49 : f32 to vector<16x1xf32>
    %136 = arith.addf %133, %135 : vector<16x1xf32>
    %137 = math.rsqrt %136 : vector<16x1xf32>
    %138 = arith.mulf %134, %137 : vector<16x1xf32>
    %c0_50 = arith.constant 0 : index
    %c0_51 = arith.constant 0 : index
    %139 = vector.load %arg11[%c0_50, %c0_51] : memref<16x1xf32, #tpu.memory_space<vmem>>, vector<16x1xf32>
    %140 = arith.mulf %124, %138 : vector<16x1xf32>
    %141 = arith.subf %139, %140 : vector<16x1xf32>
    %142 = vector.broadcast %138 : vector<16x1xf32> to vector<16x128xf32>
    %143 = arith.mulf %142, %118 : vector<16x128xf32>
    %144 = vector.broadcast %141 : vector<16x1xf32> to vector<16x128xf32>
    %145 = arith.addf %143, %144 : vector<16x128xf32>
    %146 = arith.addf %145, %0 : vector<16x128xf32>
    %cst_52 = arith.constant 0.000000e+00 : f32
    %147 = vector.broadcast %cst_52 : f32 to vector<16x128xf32>
    %148 = arith.maximumf %146, %147 : vector<16x128xf32>
    %c0_53 = arith.constant 0 : index
    %c0_54 = arith.constant 0 : index
    %149 = vector.load %arg12[%c0_53, %c0_54] : memref<16x128xf32, #tpu.memory_space<vmem>>, vector<16x128xf32>
    tpu.vector_store %arg12[%c0_53, %c0_54], %148 {strides = array<i32>} : memref<16x128xf32, #tpu.memory_space<vmem>>, vector<16x128xf32>,
    return
  }
  func.func @transform_0(%arg0: i32) -> (i32, i32) {
    %c0_i32 = arith.constant 0 : i32
    %c0_i32_0 = arith.constant 0 : i32
    %c0_i32_1 = arith.constant 0 : i32
    return %c0_i32, %c0_i32_0 : i32, i32
  }
  func.func @transform_1(%arg0: i32) -> (i32, i32) {
    %c0_i32 = arith.constant 0 : i32
    %c0_i32_0 = arith.constant 0 : i32
    %c0_i32_1 = arith.constant 0 : i32
    return %c0_i32, %c0_i32_0 : i32, i32
  }
  func.func @transform_2(%arg0: i32) -> (i32, i32) {
    %c0_i32 = arith.constant 0 : i32
    %c0_i32_0 = arith.constant 0 : i32
    %c0_i32_1 = arith.constant 0 : i32
    return %c0_i32, %c0_i32_0 : i32, i32
  }
  func.func @transform_3(%arg0: i32) -> (i32, i32) {
    %c0_i32 = arith.constant 0 : i32
    %c0_i32_0 = arith.constant 0 : i32
    %c0_i32_1 = arith.constant 0 : i32
    return %c0_i32, %c0_i32_0 : i32, i32
  }
  func.func @transform_4(%arg0: i32) -> (i32, i32) {
    %c0_i32 = arith.constant 0 : i32
    %c0_i32_0 = arith.constant 0 : i32
    %c0_i32_1 = arith.constant 0 : i32
    return %c0_i32, %c0_i32_0 : i32, i32
  }
  func.func @transform_5(%arg0: i32) -> (i32, i32) {
    %c0_i32 = arith.constant 0 : i32
    %c0_i32_0 = arith.constant 0 : i32
    %c0_i32_1 = arith.constant 0 : i32
    return %c0_i32, %c0_i32_0 : i32, i32
  }
  func.func @transform_6(%arg0: i32) -> (i32, i32) {
    %c0_i32 = arith.constant 0 : i32
    %c0_i32_0 = arith.constant 0 : i32
    %c0_i32_1 = arith.constant 0 : i32
    return %c0_i32, %c0_i32_0 : i32, i32
  }
  func.func @transform_7(%arg0: i32) -> (i32, i32) {
    %c0_i32 = arith.constant 0 : i32
    %c0_i32_0 = arith.constant 0 : i32
    %c0_i32_1 = arith.constant 0 : i32
    return %c0_i32, %c0_i32_0 : i32, i32
  }
  func.func @transform_8(%arg0: i32) -> (i32, i32) {
    %c0_i32 = arith.constant 0 : i32
    %c0_i32_0 = arith.constant 0 : i32
    %c0_i32_1 = arith.constant 0 : i32
    return %c0_i32, %c0_i32_0 : i32, i32
  }
  func.func @transform_9(%arg0: i32) -> (i32, i32) {
    %c0_i32 = arith.constant 0 : i32
    %c0_i32_0 = arith.constant 0 : i32
    %c0_i32_1 = arith.constant 0 : i32
    return %c0_i32, %c0_i32_0 : i32, i32
  }
  func.func @transform_10(%arg0: i32) -> (i32, i32) {
    %c0_i32 = arith.constant 0 : i32
    %c0_i32_0 = arith.constant 0 : i32
    %c0_i32_1 = arith.constant 0 : i32
    return %c0_i32, %c0_i32_0 : i32, i32
  }
  func.func @transform_11(%arg0: i32) -> (i32, i32) {
    %c0_i32 = arith.constant 0 : i32
    %c0_i32_0 = arith.constant 0 : i32
    %c0_i32_1 = arith.constant 0 : i32
    return %c0_i32, %c0_i32_0 : i32, i32
  }
}

module attributes {stable_mosaic.version = 11 : i64} {
  func.func @kernel(%arg0: i32, %arg1: memref<2x32xf32, #tpu.memory_space<vmem>>, %arg2: memref<32x32xf32, #tpu.memory_space<vmem>>, %arg3: memref<1x32xf32, #tpu.memory_space<vmem>>, %arg4: memref<32x1xf32, #tpu.memory_space<vmem>>, %arg5: memref<1x1xf32, #tpu.memory_space<vmem>>, %arg6: memref<2x1xf32, #tpu.memory_space<vmem>>) attributes {dimension_semantics = [#tpu.dimension_semantics<arbitrary>], iteration_bounds = array<i64: 1>, scalar_prefetch = 0 : i64, scratch_operands = 0 : i64, tpu.core_type = #tpu.core_type<tc>, window_params = [{pipeline_mode = #tpu.pipeline_mode<synchronous>, transform_indices = @transform_0, window_bounds = array<i64: 2, 32>}, {pipeline_mode = #tpu.pipeline_mode<synchronous>, transform_indices = @transform_1, window_bounds = array<i64: 32, 32>}, {pipeline_mode = #tpu.pipeline_mode<synchronous>, transform_indices = @transform_2, window_bounds = array<i64: 1, 32>}, {pipeline_mode = #tpu.pipeline_mode<synchronous>, transform_indices = @transform_3, window_bounds = array<i64: 32, 1>}, {pipeline_mode = #tpu.pipeline_mode<synchronous>, transform_indices = @transform_4, window_bounds = array<i64: 1, 1>}, {pipeline_mode = #tpu.pipeline_mode<synchronous>, transform_indices = @transform_5, window_bounds = array<i64: 2, 1>}]} {
    %c0 = arith.constant 0 : index
    %c0_0 = arith.constant 0 : index
    %0 = vector.load %arg1[%c0, %c0_0] : memref<2x32xf32, #tpu.memory_space<vmem>>, vector<2x32xf32>
    %c0_1 = arith.constant 0 : index
    %c0_2 = arith.constant 0 : index
    %1 = vector.load %arg2[%c0_1, %c0_2] : memref<32x32xf32, #tpu.memory_space<vmem>>, vector<32x32xf32>
    %c0_3 = arith.constant 0 : index
    %c0_4 = arith.constant 0 : index
    %2 = vector.load %arg3[%c0_3, %c0_4] : memref<1x32xf32, #tpu.memory_space<vmem>>, vector<1x32xf32>
    %cst = arith.constant dense<0.000000e+00> : vector<2x32xf32>
    %3 = tpu.matmul %0, %1, %cst {dimension_numbers = #tpu.dot_dimension_numbers<[1], [0], [0], [1], [0, 0, 1, 1], [], []>} : vector<2x32xf32>, vector<32x32xf32>, vector<2x32xf32> -> vector<2x32xf32>
    %4 = vector.broadcast %2 : vector<1x32xf32> to vector<2x32xf32>
    %5 = arith.addf %3, %4 : vector<2x32xf32>
    %cst_5 = arith.constant 0.000000e+00 : f32
    %6 = vector.broadcast %cst_5 : f32 to vector<2x32xf32>
    %7 = arith.cmpf ogt, %5, %6 : vector<2x32xf32>
    %cst_6 = arith.constant 0.000000e+00 : f32
    %8 = vector.broadcast %cst_6 : f32 to vector<2x32xf32>
    %9 = arith.minimumf %5, %8 : vector<2x32xf32>
    %10 = math.exp %9 : vector<2x32xf32>
    %cst_7 = arith.constant 1.000000e+00 : f32
    %11 = vector.broadcast %cst_7 : f32 to vector<2x32xf32>
    %12 = arith.subf %10, %11 : vector<2x32xf32>
    %13 = arith.select %7, %5, %12 : vector<2x32xi1>, vector<2x32xf32>
    %c0_8 = arith.constant 0 : index
    %c0_9 = arith.constant 0 : index
    %14 = vector.load %arg4[%c0_8, %c0_9] : memref<32x1xf32, #tpu.memory_space<vmem>>, vector<32x1xf32>
    %c0_10 = arith.constant 0 : index
    %c0_11 = arith.constant 0 : index
    %15 = vector.load %arg5[%c0_10, %c0_11] : memref<1x1xf32, #tpu.memory_space<vmem>>, vector<1x1xf32>
    %cst_12 = arith.constant dense<0.000000e+00> : vector<2x1xf32>
    %16 = tpu.matmul %13, %14, %cst_12 {dimension_numbers = #tpu.dot_dimension_numbers<[1], [0], [0], [1], [0, 0, 1, 1], [], []>} : vector<2x32xf32>, vector<32x1xf32>, vector<2x1xf32> -> vector<2x1xf32>
    %17 = vector.broadcast %15 : vector<1x1xf32> to vector<2x1xf32>
    %18 = arith.addf %16, %17 : vector<2x1xf32>
    %cst_13 = arith.constant 0.000000e+00 : f32
    %19 = vector.broadcast %cst_13 : f32 to vector<2x1xf32>
    %20 = arith.subf %19, %18 : vector<2x1xf32>
    %21 = math.exp %20 : vector<2x1xf32>
    %cst_14 = arith.constant 1.000000e+00 : f32
    %22 = vector.broadcast %cst_14 : f32 to vector<2x1xf32>
    %23 = arith.addf %22, %21 : vector<2x1xf32>
    %cst_15 = arith.constant 1.000000e+00 : f32
    %24 = vector.broadcast %cst_15 : f32 to vector<2x1xf32>
    %25 = arith.divf %24, %23 : vector<2x1xf32>
    %c0_16 = arith.constant 0 : index
    %c0_17 = arith.constant 0 : index
    %26 = vector.load %arg6[%c0_16, %c0_17] : memref<2x1xf32, #tpu.memory_space<vmem>>, vector<2x1xf32>
    tpu.vector_store %arg6[%c0_16, %c0_17], %25 {strides = array<i32>} : memref<2x1xf32, #tpu.memory_space<vmem>>, vector<2x1xf32>,
    return
  }
  func.func @transform_0(%arg0: i32) -> (i32, i32) {
    %c0_i32 = arith.constant 0 : i32
    %c0_i32_0 = arith.constant 0 : i32
    %c0_i32_1 = arith.constant 0 : i32
    return %c0_i32, %c0_i32_0 : i32, i32
  }
  func.func @transform_1(%arg0: i32) -> (i32, i32) {
    %c0_i32 = arith.constant 0 : i32
    %c0_i32_0 = arith.constant 0 : i32
    %c0_i32_1 = arith.constant 0 : i32
    return %c0_i32, %c0_i32_0 : i32, i32
  }
  func.func @transform_2(%arg0: i32) -> (i32, i32) {
    %c0_i32 = arith.constant 0 : i32
    %c0_i32_0 = arith.constant 0 : i32
    %c0_i32_1 = arith.constant 0 : i32
    return %c0_i32, %c0_i32_0 : i32, i32
  }
  func.func @transform_3(%arg0: i32) -> (i32, i32) {
    %c0_i32 = arith.constant 0 : i32
    %c0_i32_0 = arith.constant 0 : i32
    %c0_i32_1 = arith.constant 0 : i32
    return %c0_i32, %c0_i32_0 : i32, i32
  }
  func.func @transform_4(%arg0: i32) -> (i32, i32) {
    %c0_i32 = arith.constant 0 : i32
    %c0_i32_0 = arith.constant 0 : i32
    %c0_i32_1 = arith.constant 0 : i32
    return %c0_i32, %c0_i32_0 : i32, i32
  }
  func.func @transform_5(%arg0: i32) -> (i32, i32) {
    %c0_i32 = arith.constant 0 : i32
    %c0_i32_0 = arith.constant 0 : i32
    %c0_i32_1 = arith.constant 0 : i32
    return %c0_i32, %c0_i32_0 : i32, i32
  }
}

module attributes {stable_mosaic.version = 11 : i64} {
  func.func @kernel(%arg0: i32, %arg1: memref<2x32xf32, #tpu.memory_space<vmem>>, %arg2: memref<32x32xf32, #tpu.memory_space<vmem>>, %arg3: memref<1x32xf32, #tpu.memory_space<vmem>>, %arg4: memref<32x3xf32, #tpu.memory_space<vmem>>, %arg5: memref<1x3xf32, #tpu.memory_space<vmem>>, %arg6: memref<2x3xf32, #tpu.memory_space<vmem>>) attributes {dimension_semantics = [#tpu.dimension_semantics<arbitrary>], iteration_bounds = array<i64: 1>, scalar_prefetch = 0 : i64, scratch_operands = 0 : i64, tpu.core_type = #tpu.core_type<tc>, window_params = [{pipeline_mode = #tpu.pipeline_mode<synchronous>, transform_indices = @transform_0, window_bounds = array<i64: 2, 32>}, {pipeline_mode = #tpu.pipeline_mode<synchronous>, transform_indices = @transform_1, window_bounds = array<i64: 32, 32>}, {pipeline_mode = #tpu.pipeline_mode<synchronous>, transform_indices = @transform_2, window_bounds = array<i64: 1, 32>}, {pipeline_mode = #tpu.pipeline_mode<synchronous>, transform_indices = @transform_3, window_bounds = array<i64: 32, 3>}, {pipeline_mode = #tpu.pipeline_mode<synchronous>, transform_indices = @transform_4, window_bounds = array<i64: 1, 3>}, {pipeline_mode = #tpu.pipeline_mode<synchronous>, transform_indices = @transform_5, window_bounds = array<i64: 2, 3>}]} {
    %c0 = arith.constant 0 : index
    %c0_0 = arith.constant 0 : index
    %0 = vector.load %arg1[%c0, %c0_0] : memref<2x32xf32, #tpu.memory_space<vmem>>, vector<2x32xf32>
    %c0_1 = arith.constant 0 : index
    %c0_2 = arith.constant 0 : index
    %1 = vector.load %arg2[%c0_1, %c0_2] : memref<32x32xf32, #tpu.memory_space<vmem>>, vector<32x32xf32>
    %c0_3 = arith.constant 0 : index
    %c0_4 = arith.constant 0 : index
    %2 = vector.load %arg3[%c0_3, %c0_4] : memref<1x32xf32, #tpu.memory_space<vmem>>, vector<1x32xf32>
    %cst = arith.constant dense<0.000000e+00> : vector<2x32xf32>
    %3 = tpu.matmul %0, %1, %cst {dimension_numbers = #tpu.dot_dimension_numbers<[1], [0], [0], [1], [0, 0, 1, 1], [], []>} : vector<2x32xf32>, vector<32x32xf32>, vector<2x32xf32> -> vector<2x32xf32>
    %4 = vector.broadcast %2 : vector<1x32xf32> to vector<2x32xf32>
    %5 = arith.addf %3, %4 : vector<2x32xf32>
    %cst_5 = arith.constant 0.000000e+00 : f32
    %6 = vector.broadcast %cst_5 : f32 to vector<2x32xf32>
    %7 = arith.cmpf ogt, %5, %6 : vector<2x32xf32>
    %cst_6 = arith.constant 0.000000e+00 : f32
    %8 = vector.broadcast %cst_6 : f32 to vector<2x32xf32>
    %9 = arith.minimumf %5, %8 : vector<2x32xf32>
    %10 = math.exp %9 : vector<2x32xf32>
    %cst_7 = arith.constant 1.000000e+00 : f32
    %11 = vector.broadcast %cst_7 : f32 to vector<2x32xf32>
    %12 = arith.subf %10, %11 : vector<2x32xf32>
    %13 = arith.select %7, %5, %12 : vector<2x32xi1>, vector<2x32xf32>
    %c0_8 = arith.constant 0 : index
    %c0_9 = arith.constant 0 : index
    %14 = vector.load %arg4[%c0_8, %c0_9] : memref<32x3xf32, #tpu.memory_space<vmem>>, vector<32x3xf32>
    %c0_10 = arith.constant 0 : index
    %c0_11 = arith.constant 0 : index
    %15 = vector.load %arg5[%c0_10, %c0_11] : memref<1x3xf32, #tpu.memory_space<vmem>>, vector<1x3xf32>
    %cst_12 = arith.constant dense<0.000000e+00> : vector<2x3xf32>
    %16 = tpu.matmul %13, %14, %cst_12 {dimension_numbers = #tpu.dot_dimension_numbers<[1], [0], [0], [1], [0, 0, 1, 1], [], []>} : vector<2x32xf32>, vector<32x3xf32>, vector<2x3xf32> -> vector<2x3xf32>
    %17 = vector.broadcast %15 : vector<1x3xf32> to vector<2x3xf32>
    %18 = arith.addf %16, %17 : vector<2x3xf32>
    %c0_13 = arith.constant 0 : index
    %c0_14 = arith.constant 0 : index
    %19 = vector.load %arg6[%c0_13, %c0_14] : memref<2x3xf32, #tpu.memory_space<vmem>>, vector<2x3xf32>
    tpu.vector_store %arg6[%c0_13, %c0_14], %18 {strides = array<i32>} : memref<2x3xf32, #tpu.memory_space<vmem>>, vector<2x3xf32>,
    return
  }
  func.func @transform_0(%arg0: i32) -> (i32, i32) {
    %c0_i32 = arith.constant 0 : i32
    %c0_i32_0 = arith.constant 0 : i32
    %c0_i32_1 = arith.constant 0 : i32
    return %c0_i32, %c0_i32_0 : i32, i32
  }
  func.func @transform_1(%arg0: i32) -> (i32, i32) {
    %c0_i32 = arith.constant 0 : i32
    %c0_i32_0 = arith.constant 0 : i32
    %c0_i32_1 = arith.constant 0 : i32
    return %c0_i32, %c0_i32_0 : i32, i32
  }
  func.func @transform_2(%arg0: i32) -> (i32, i32) {
    %c0_i32 = arith.constant 0 : i32
    %c0_i32_0 = arith.constant 0 : i32
    %c0_i32_1 = arith.constant 0 : i32
    return %c0_i32, %c0_i32_0 : i32, i32
  }
  func.func @transform_3(%arg0: i32) -> (i32, i32) {
    %c0_i32 = arith.constant 0 : i32
    %c0_i32_0 = arith.constant 0 : i32
    %c0_i32_1 = arith.constant 0 : i32
    return %c0_i32, %c0_i32_0 : i32, i32
  }
  func.func @transform_4(%arg0: i32) -> (i32, i32) {
    %c0_i32 = arith.constant 0 : i32
    %c0_i32_0 = arith.constant 0 : i32
    %c0_i32_1 = arith.constant 0 : i32
    return %c0_i32, %c0_i32_0 : i32, i32
  }
  func.func @transform_5(%arg0: i32) -> (i32, i32) {
    %c0_i32 = arith.constant 0 : i32
    %c0_i32_0 = arith.constant 0 : i32
    %c0_i32_1 = arith.constant 0 : i32
    return %c0_i32, %c0_i32_0 : i32, i32
  }
}

module attributes {stable_mosaic.version = 11 : i64} {
  func.func @kernel(%arg0: i32, %arg1: memref<2x64xf32, #tpu.memory_space<vmem>>, %arg2: memref<64x32xf32, #tpu.memory_space<vmem>>, %arg3: memref<1x32xf32, #tpu.memory_space<vmem>>, %arg4: memref<32x6xf32, #tpu.memory_space<vmem>>, %arg5: memref<1x6xf32, #tpu.memory_space<vmem>>, %arg6: memref<2x6xf32, #tpu.memory_space<vmem>>) attributes {dimension_semantics = [#tpu.dimension_semantics<arbitrary>], iteration_bounds = array<i64: 1>, scalar_prefetch = 0 : i64, scratch_operands = 0 : i64, tpu.core_type = #tpu.core_type<tc>, window_params = [{pipeline_mode = #tpu.pipeline_mode<synchronous>, transform_indices = @transform_0, window_bounds = array<i64: 2, 64>}, {pipeline_mode = #tpu.pipeline_mode<synchronous>, transform_indices = @transform_1, window_bounds = array<i64: 64, 32>}, {pipeline_mode = #tpu.pipeline_mode<synchronous>, transform_indices = @transform_2, window_bounds = array<i64: 1, 32>}, {pipeline_mode = #tpu.pipeline_mode<synchronous>, transform_indices = @transform_3, window_bounds = array<i64: 32, 6>}, {pipeline_mode = #tpu.pipeline_mode<synchronous>, transform_indices = @transform_4, window_bounds = array<i64: 1, 6>}, {pipeline_mode = #tpu.pipeline_mode<synchronous>, transform_indices = @transform_5, window_bounds = array<i64: 2, 6>}]} {
    %c0 = arith.constant 0 : index
    %c0_0 = arith.constant 0 : index
    %0 = vector.load %arg1[%c0, %c0_0] : memref<2x64xf32, #tpu.memory_space<vmem>>, vector<2x64xf32>
    %c0_1 = arith.constant 0 : index
    %c0_2 = arith.constant 0 : index
    %1 = vector.load %arg2[%c0_1, %c0_2] : memref<64x32xf32, #tpu.memory_space<vmem>>, vector<64x32xf32>
    %c0_3 = arith.constant 0 : index
    %c0_4 = arith.constant 0 : index
    %2 = vector.load %arg3[%c0_3, %c0_4] : memref<1x32xf32, #tpu.memory_space<vmem>>, vector<1x32xf32>
    %cst = arith.constant dense<0.000000e+00> : vector<2x32xf32>
    %3 = tpu.matmul %0, %1, %cst {dimension_numbers = #tpu.dot_dimension_numbers<[1], [0], [0], [1], [0, 0, 1, 1], [], []>} : vector<2x64xf32>, vector<64x32xf32>, vector<2x32xf32> -> vector<2x32xf32>
    %4 = vector.broadcast %2 : vector<1x32xf32> to vector<2x32xf32>
    %5 = arith.addf %3, %4 : vector<2x32xf32>
    %cst_5 = arith.constant 0.000000e+00 : f32
    %6 = vector.broadcast %cst_5 : f32 to vector<2x32xf32>
    %7 = arith.cmpf ogt, %5, %6 : vector<2x32xf32>
    %cst_6 = arith.constant 0.000000e+00 : f32
    %8 = vector.broadcast %cst_6 : f32 to vector<2x32xf32>
    %9 = arith.minimumf %5, %8 : vector<2x32xf32>
    %10 = math.exp %9 : vector<2x32xf32>
    %cst_7 = arith.constant 1.000000e+00 : f32
    %11 = vector.broadcast %cst_7 : f32 to vector<2x32xf32>
    %12 = arith.subf %10, %11 : vector<2x32xf32>
    %13 = arith.select %7, %5, %12 : vector<2x32xi1>, vector<2x32xf32>
    %c0_8 = arith.constant 0 : index
    %c0_9 = arith.constant 0 : index
    %14 = vector.load %arg4[%c0_8, %c0_9] : memref<32x6xf32, #tpu.memory_space<vmem>>, vector<32x6xf32>
    %c0_10 = arith.constant 0 : index
    %c0_11 = arith.constant 0 : index
    %15 = vector.load %arg5[%c0_10, %c0_11] : memref<1x6xf32, #tpu.memory_space<vmem>>, vector<1x6xf32>
    %cst_12 = arith.constant dense<0.000000e+00> : vector<2x6xf32>
    %16 = tpu.matmul %13, %14, %cst_12 {dimension_numbers = #tpu.dot_dimension_numbers<[1], [0], [0], [1], [0, 0, 1, 1], [], []>} : vector<2x32xf32>, vector<32x6xf32>, vector<2x6xf32> -> vector<2x6xf32>
    %17 = vector.broadcast %15 : vector<1x6xf32> to vector<2x6xf32>
    %18 = arith.addf %16, %17 : vector<2x6xf32>
    %c0_13 = arith.constant 0 : index
    %c0_14 = arith.constant 0 : index
    %19 = vector.load %arg6[%c0_13, %c0_14] : memref<2x6xf32, #tpu.memory_space<vmem>>, vector<2x6xf32>
    tpu.vector_store %arg6[%c0_13, %c0_14], %18 {strides = array<i32>} : memref<2x6xf32, #tpu.memory_space<vmem>>, vector<2x6xf32>,
    return
  }
  func.func @transform_0(%arg0: i32) -> (i32, i32) {
    %c0_i32 = arith.constant 0 : i32
    %c0_i32_0 = arith.constant 0 : i32
    %c0_i32_1 = arith.constant 0 : i32
    return %c0_i32, %c0_i32_0 : i32, i32
  }
  func.func @transform_1(%arg0: i32) -> (i32, i32) {
    %c0_i32 = arith.constant 0 : i32
    %c0_i32_0 = arith.constant 0 : i32
    %c0_i32_1 = arith.constant 0 : i32
    return %c0_i32, %c0_i32_0 : i32, i32
  }
  func.func @transform_2(%arg0: i32) -> (i32, i32) {
    %c0_i32 = arith.constant 0 : i32
    %c0_i32_0 = arith.constant 0 : i32
    %c0_i32_1 = arith.constant 0 : i32
    return %c0_i32, %c0_i32_0 : i32, i32
  }
  func.func @transform_3(%arg0: i32) -> (i32, i32) {
    %c0_i32 = arith.constant 0 : i32
    %c0_i32_0 = arith.constant 0 : i32
    %c0_i32_1 = arith.constant 0 : i32
    return %c0_i32, %c0_i32_0 : i32, i32
  }
  func.func @transform_4(%arg0: i32) -> (i32, i32) {
    %c0_i32 = arith.constant 0 : i32
    %c0_i32_0 = arith.constant 0 : i32
    %c0_i32_1 = arith.constant 0 : i32
    return %c0_i32, %c0_i32_0 : i32, i32
  }
  func.func @transform_5(%arg0: i32) -> (i32, i32) {
    %c0_i32 = arith.constant 0 : i32
    %c0_i32_0 = arith.constant 0 : i32
    %c0_i32_1 = arith.constant 0 : i32
    return %c0_i32, %c0_i32_0 : i32, i32
  }
}

</mosaic_0001>

<bundles_post_ra>
// kernel: prediction_network_forward.11
= control target key start
LH: loop header
LB: loop body
LE: loop exit
PB: predicated region body
PF: predicated region fallthrough
CT: control target
= control target key end

     0   :  { %v292_v3 = vmov 0.0|0.0   ;;  %vm293_vm0 = vmmov 0   ;;  %v294_v6 = vmov 0.0   ;;  %s373_s0 = inlined_call_operand.vmem [shape: f32[2,32], index: 0, kind: input, shape index: {}]   ;;  %s374_s1 = inlined_call_operand.vmem [shape: f32[32,32], index: 1, kind: input, shape index: {}]   ;;  %s375_s2 = inlined_call_operand.vmem [shape: f32[1,32], index: 2, kind: input, shape index: {}]   ;;  %s376_s3 = inlined_call_operand.vmem [shape: f32[32,3], index: 3, kind: input, shape index: {}]   ;;  %s377_s4 = inlined_call_operand.vmem [shape: f32[1,3], index: 4, kind: input, shape index: {}]   ;;  %s378_s5 = inlined_call_operand.hbm [shape: f32[2,3], index: 5, kind: output, shape index: {}]  }
   0x1   :  { %v22_v0 = vld [vmem:[%s374_s1] sm:$0xff]  ;;  %v23_v1 = vld [vmem:[%s374_s1 + $0x8] sm:$0xff]  ;;  %v24_v2 = vld [vmem:[%s374_s1 + $0x10] sm:$0xff]  ;;  %250 = vmatprep.subr.bf16.mxu0 %v292_v3  ;;  %236 = vmatprep.mubr.msk.f32.mxu0 %vm293_vm0, %v294_v6 }
   0x2   :  { %v251_v4 = vpack.c.bf16 %v23_v1, %v22_v0  ;;  %v25_v5 = vld [vmem:[%s374_s1 + $0x18] sm:$0xff]  ;;  %256 = vmatprep.subr.bf16.mxu1 %v292_v3  ;;  %247 = vmatprep.mubr.msk.f32.mxu1 %vm293_vm0, %v294_v6 }
   0x3   :  { %10 = vsyncpa [#allocation3], 0  ;;  %v254_v7 = vpack.c.bf16 %v25_v5, %v24_v2  ;;  %v21_v8 = vld [vmem:[%s373_s0] sm:$0x3]  ;;  %vm33_vm1 = vcmask 261120   ;;  %v114_v10 = vld [vmem:[%s376_s3 + $0x8] sm:$0xff] }
   0x4   :  { %252 = vmatpush3.bf16.msra.mxu0 %v251_v4  ;;  %v113_v9 = vld [vmem:[%s376_s3] sm:$0xff]  ;;  %v115_v11 = vld [vmem:[%s376_s3 + $0x10] sm:$0xff]  ;;  %v116_v13 = vld [vmem:[%s376_s3 + $0x18] sm:$0xff]  ;;  %s295_s12 = smov [#allocation2]   ;;  %vm197_vm3 = vcmask 17408  }
   0x5   :  { %253 = vmatprep.subr.bf16.mxu0 %v292_v3  ;;  %v257_v12 = vpack.c.bf16 %v114_v10, %v113_v9  ;;  %v260_v14 = vpack.c.bf16 %v116_v13, %v115_v11  ;;  %v213_v15 = vld [vmem:[%s375_s2] ss:$0 sm:$0xff]  ;;  %s205_s13 = sshll.u32 %s295_s12, 4  ;;  %s206_s13 = int_to_ptr.vmem [resolvable:$true] %s205_s13 }
   0x6   :  { %v216_v24 = vld [vmem:[%s377_s4] ss:$0 sm:$0xff]  ;;  %s268_s2 = scalar_lea.vmem %s206_s13, 32  ;;  %p273_p1 = scmp.lt.s32.totalorder %s206_s13, %s206_s13 }
   0x7   :  { %258 = vmatpush3.bf16.msra.mxu1 %v257_v12  ;;  %p269_p0 = scmp.ne.s32.totalorder %s206_s13, %s268_s2  ;;  %p274_p2 = scmp.lt.s32.totalorder %s268_s2, %s268_s2 }
   0x8   :  { %255 = vmatpush3.bf16.msra.mxu0 %v254_v7  ;;  %259 = vmatprep.subr.bf16.mxu1 %v292_v3 }
   0x9   :  { %p275_p3 = por %p274_p2, %p273_p1 }
   0xb   :  { %237 = vmatmul.mubr.msk.f32.vlgmr.msra.gmra.mrb[0].mxu0 %vm33_vm1, %v21_v8  ;;  %261 = vmatpush3.bf16.msra.mxu1 %v260_v14  ;;  %p276_p4 = pnand %p275_p3, %p269_p0 }
  0xde   :  { %v103_v16 = vpop.f32.mrb[0].mxu0 }
  0xdf   :  { %v104_v17 = vadd.f32 %v213_v15, %v103_v16  ;;  %v238_v18 = vpop.f32.mrb[1].mxu0 }
  0xe1   :  { %v108_v19 = vmin.f32 %v104_v17, 0.0  ;;  %vm107_vm2 = vcmp.gt.f32.partialorder %v104_v17, 0.0 }
  0xe3   :  { %v109_v20 = vmul.f32 1.442695, %v108_v19 }
  0xe5   :  { %266 = vpow2.f32 %v109_v20 }
  0xef   :  { %v267_v21 = vpop.eup %266 }
  0xf0   :  { %v215_v22 = vadd.f32 -1.0, %v267_v21 }
  0xf2   :  { %v112_v23 = vsel %vm107_vm2, %v104_v17, %v215_v22 }
  0xf3   :  { %248 = vmatmul.mubr.msk.f32.vlgmr.msra.gmra.mrb[0].mxu1 %vm33_vm1, %v112_v23 }
 0x1c6   :  { %v193_v25 = vpop.f32.mrb[0].mxu1 }
 0x1c7   :  { %v194_v26 = vadd.f32 %v216_v24, %v193_v25  ;;  %v249_v27 = vpop.f32.mrb[1].mxu1 }
 0x1c9   :  { %198 = vst.msk [vmem:[#allocation2] sm:$0x3] %vm197_vm3, %v194_v26 }
 0x1ca   :  { %279 = shalt.err (!%p276_p4)
}
 0x1cb   :  { %s280_s16 = scalar_lea.hbm %s378_s5, 32 }
 0x1cc   :  { %p281_p5 = scmp.ne.s32.totalorder %s378_s5, %s280_s16  ;;  %p284_p6 = scmp.lt.u32.totalorder %s280_s16, %s378_s5 }
 0x1ce   :  { %p286_p7 = pnand %p284_p6, %p281_p5 }
 0x1d0   :  { %289 = shalt.err (!%p286_p7)
}
 0x1d1   :  { %208 = dma.vmem_to_hbm [thread:$0]  %s206_s13, 32, %s378_s5, [#allocation3]  }
 0x1d2   :  { %290 = dma.done.wait [#allocation3], 32  }
 0x1d3   :  { %291 = vsyncadd [#allocation3], 4294967264 }
 0x1d4   :  { %212 = vsyncpa [#allocation3], 1 }

// kernel: prediction_network_forward.9
= control target key start
LH: loop header
LB: loop body
LE: loop exit
PB: predicated region body
PF: predicated region fallthrough
CT: control target
= control target key end

     0   :  { %v268_v0 = vmov 0.0|0.0   ;;  %vm269_vm0 = vmmov 0   ;;  %v270_v4 = vmov 0.0   ;;  %vm34_vm1 = vcmask 261120   ;;  %s339_s1 = inlined_call_operand.vmem [shape: f32[32,32], index: 1, kind: input, shape index: {}]   ;;  %s340_s0 = inlined_call_operand.vmem [shape: f32[2,32], index: 0, kind: input, shape index: {}]   ;;  %s341_s3 = inlined_call_operand.vmem [shape: f32[32,1], index: 3, kind: input, shape index: {}]   ;;  %s342_s4 = inlined_call_operand.<no memory space> [shape: f32[1,1], index: 4, kind: input, shape index: {}]   ;;  %s343_s2 = inlined_call_operand.vmem [shape: f32[1,32], index: 2, kind: input, shape index: {}]   ;;  %s344_s5 = inlined_call_operand.vmem [shape: f32[2,1], index: 5, kind: output, shape index: {}]  }
   0x1   :  { %247 = vmatprep.subr.bf16.mxu0 %v268_v0  ;;  %v23_v1 = vld [vmem:[%s339_s1] sm:$0xff]  ;;  %v24_v2 = vld [vmem:[%s339_s1 + $0x8] sm:$0xff]  ;;  %v25_v3 = vld [vmem:[%s339_s1 + $0x10] sm:$0xff]  ;;  %233 = vmatprep.mubr.msk.f32.mxu0 %vm269_vm0, %v270_v4  ;;  %v10_v15 = vstv %s342_s4  ;;  %vm204_vm3 = vcmask 1024  }
   0x2   :  { %v248_v5 = vpack.c.bf16 %v24_v2, %v23_v1  ;;  %v26_v6 = vld [vmem:[%s339_s1 + $0x18] sm:$0xff]  ;;  %253 = vmatprep.subr.bf16.mxu1 %v268_v0  ;;  %244 = vmatprep.mubr.msk.f32.mxu1 %vm269_vm0, %v270_v4  ;;  %v22_v8 = vld [vmem:[%s340_s0] sm:$0x3]  ;;  %v115_v10 = vld [vmem:[%s341_s3 + $0x8] sm:$0xff]  ;;  %11 = vst [vmem:[#allocation2] sm:$0x1] %v10_v15 }
   0x3   :  { %v251_v7 = vpack.c.bf16 %v26_v6, %v25_v3  ;;  %v114_v9 = vld [vmem:[%s341_s3] sm:$0xff]  ;;  %v116_v11 = vld [vmem:[%s341_s3 + $0x10] sm:$0xff]  ;;  %v117_v13 = vld [vmem:[%s341_s3 + $0x18] sm:$0xff] }
   0x4   :  { %249 = vmatpush3.bf16.msra.mxu0 %v248_v5  ;;  %v254_v12 = vpack.c.bf16 %v115_v10, %v114_v9  ;;  %v257_v14 = vpack.c.bf16 %v117_v13, %v116_v11  ;;  %v210_v16 = vld [vmem:[%s343_s2] ss:$0 sm:$0xff] }
   0x5   :  { %250 = vmatprep.subr.bf16.mxu0 %v268_v0 }
   0x6   :  { %255 = vmatpush3.bf16.msra.mxu1 %v254_v12 }
   0x7   :  { %256 = vmatprep.subr.bf16.mxu1 %v268_v0 }
   0x8   :  { %252 = vmatpush3.bf16.msra.mxu0 %v251_v7 }
   0x9   :  { %v213_v25 = vld [vmem:[#allocation2] ss:$0 sm:$0xff] }
   0xa   :  { %258 = vmatpush3.bf16.msra.mxu1 %v257_v14 }
   0xb   :  { %234 = vmatmul.mubr.msk.f32.vlgmr.msra.gmra.mrb[0].mxu0 %vm34_vm1, %v22_v8 }
  0xde   :  { %v104_v17 = vpop.f32.mrb[0].mxu0 }
  0xdf   :  { %v105_v18 = vadd.f32 %v210_v16, %v104_v17  ;;  %v235_v19 = vpop.f32.mrb[1].mxu0 }
  0xe1   :  { %v109_v20 = vmin.f32 %v105_v18, 0.0  ;;  %vm108_vm2 = vcmp.gt.f32.partialorder %v105_v18, 0.0 }
  0xe3   :  { %v110_v21 = vmul.f32 1.442695, %v109_v20 }
  0xe5   :  { %262 = vpow2.f32 %v110_v21 }
  0xef   :  { %v263_v22 = vpop.eup %262 }
  0xf0   :  { %v212_v23 = vadd.f32 -1.0, %v263_v22 }
  0xf2   :  { %v113_v24 = vsel %vm108_vm2, %v105_v18, %v212_v23 }
  0xf3   :  { %245 = vmatmul.mubr.msk.f32.vlgmr.msra.gmra.mrb[0].mxu1 %vm34_vm1, %v113_v24 }
 0x1c6   :  { %v194_v26 = vpop.f32.mrb[0].mxu1 }
 0x1c7   :  { %v195_v27 = vadd.f32 %v213_v25, %v194_v26  ;;  %v246_v28 = vpop.f32.mrb[1].mxu1 }
 0x1c9   :  { %v198_v29 = vsub.f32 0.0, %v195_v27 }
 0x1cb   :  { %v199_v30 = vmul.f32 1.442695, %v198_v29 }
 0x1cd   :  { %264 = vpow2.f32 %v199_v30 }
 0x1d7   :  { %v265_v31 = vpop.eup %264 }
 0x1d8   :  { %v201_v32 = vadd.f32 1.0, %v265_v31 }
 0x1da   :  { %266 = vrcp.f32 %v201_v32 }
 0x1e4   :  { %v267_v33 = vpop.eup %266 }
 0x1e5   :  { %205 = vst.msk [vmem:[%s344_s5] sm:$0x3] %vm204_vm3, %v267_v33 }

// kernel: prediction_network_forward.8
= control target key start
LH: loop header
LB: loop body
LE: loop exit
PB: predicated region body
PF: predicated region fallthrough
CT: control target
= control target key end

     0   :  { %v87_v0 = vmov 0.0   ;;  %vm88_vm0 = vmmov 0   ;;  %v89_v4 = vmov 0   ;;  %vm25_vm1 = vcmask 130048   ;;  %s125_s0 = inlined_call_operand.vmem [shape: f32[16,128], index: 0, kind: input, shape index: {}]   ;;  %s126_s2 = inlined_call_operand.vmem [shape: f32[8,1], index: 2, kind: input, shape index: {}]   ;;  %s127_s1 = inlined_call_operand.vmem [shape: bf16[8,16], index: 1, kind: input, shape index: {}]   ;;  %s128_s3 = inlined_call_operand.vmem [shape: f32[8,128], index: 3, kind: output, shape index: {}]  }
   0x1   :  { %77 = vmatprep.subr.bf16.mxu0 %v87_v0  ;;  %v16_v1 = vld [vmem:[%s125_s0] sm:$0xff]  ;;  %v17_v2 = vld [vmem:[%s125_s0 + $0x8] sm:$0xff]  ;;  %79 = vmatprep.mubr.msk.bf16.mxu0 %vm88_vm0, %v87_v0 }
   0x2   :  { %v18_v3 = vpack.c.bf16 %v17_v2, %v16_v1  ;;  %86 = vset.pattern.permute.xlu0 %v89_v4  ;;  %v19_v5 = vld [vmem:[%s126_s2] sm:$0xff] }
   0x3   :  { %22 = vperm.xlu0 %86, %v19_v5   ;;  %v15_v6 = vld [vmem:[%s127_s1] sm:$0xf] }
   0x4   :  { %78 = vmatpush3.bf16.msra.mxu0 %v18_v3 }
   0x7   :  { %80 = vmatmul.mubr.msk.bf16.vlgmr.msra.gmra.mrb[0].mxu0 %vm25_vm1, %v15_v6 }
  0x82   :  { %v23_v7 = vpop.permute.xlu0 %22 }
  0xda   :  { %v63_v8 = vpop.f32.mrb[0].mxu0 }
  0xdb   :  { %v64_v9 = vadd.f32 %v63_v8, %v23_v7  ;;  %v81_v10 = vpop.f32.mrb[1].mxu0 }
  0xdc   :  { %v66_v11 = vpop.f32.mrb[2].mxu0 }
  0xdd   :  { %69 = vst [vmem:[%s128_s3] sm:$0xff] %v64_v9  ;;  %v82_v12 = vpop.f32.mrb[3].mxu0 }

// kernel: prediction_network_forward.6
= control target key start
LH: loop header
LB: loop body
LE: loop exit
PB: predicated region body
PF: predicated region fallthrough
CT: control target
= control target key end

     0   :  { %v633_v1 = vmov 0.0   ;;  %vm634_vm0 = vmmov 0   ;;  %s635_s19 = smov 1   ;;  %s636_s20 = smov 127   ;;  %v41_v3 = vlaneseq  ;;  %vm87_vm2 = vcmask 130048   ;;  %s821_s0 = inlined_call_operand.vmem [shape: f32[16,128], index: 0, kind: input, shape index: {}]   ;;  %s822_s1 = inlined_call_operand.vmem [shape: bf16[16,16], index: 1, kind: input, shape index: {}]   ;;  %s823_s2 = inlined_call_operand.vmem [shape: bf16[16,16], index: 2, kind: input, shape index: {}]   ;;  %s824_s3 = inlined_call_operand.vmem [shape: bf16[16,16], index: 3, kind: input, shape index: {}]   ;;  %s825_s7 = inlined_call_operand.vmem [shape: f32[16,1], index: 7, kind: input, shape index: {}]   ;;  %s826_s8 = inlined_call_operand.vmem [shape: f32[16,1], index: 8, kind: input, shape index: {}]   ;;  %s827_s4 = inlined_call_operand.vmem [shape: bf16[16,16], index: 4, kind: input, shape index: {}]   ;;  %s828_s5 = inlined_call_operand.vmem [shape: bf16[16,16], index: 5, kind: input, shape index: {}]   ;;  %s829_s6 = inlined_call_operand.vmem [shape: bf16[16,16], index: 6, kind: input, shape index: {}]   ;;  %s830_s9 = inlined_call_operand.vmem [shape: f32[16,1], index: 9, kind: input, shape index: {}]   ;;  %s831_s10 = inlined_call_operand.vmem [shape: f32[16,1], index: 10, kind: input, shape index: {}]   ;;  %s832_s11 = inlined_call_operand.vmem [shape: f32[16,128], index: 11, kind: output, shape index: {}]  }
   0x1   :  { %v701_v0 = vld [vmem:[%s821_s0] sm:$0xff]  ;;  %560 = vmatprep.subr.bf16.mxu0 %v633_v1  ;;  %562 = vmatprep.mubr.msk.bf16.mxu0 %vm634_vm0, %v633_v1  ;;  %v713_v2 = vld [vmem:[%s821_s0 + $0x8] sm:$0xff]  ;;  %v637_v39 = vmov 0  }
   0x2   :  { %64 = vrot.lane.b32.xlu0 %v701_v0, %s635_s19  ;;  %70 = vrot.lane.b32.xlu1 %v701_v0, %s636_s20  ;;  %v42_v4 = vand.u32 127, %v41_v3  ;;  %v619_v13 = vld [vmem:[%s822_s1] sm:$0xff]   ;;  %v78_v14 = vpack.c.bf16 %v713_v2, %v701_v0  ;;  %v256_v50 = vld [vmem:[%s825_s7 + $0x8] sm:$0xff] }
   0x3   :  { %578 = vmatprep.subr.bf16.mxu1 %v633_v1  ;;  %580 = vmatprep.mubr.msk.bf16.mxu1 %vm634_vm0, %v633_v1  ;;  %v620_v19 = vld [vmem:[%s823_s2] sm:$0xff]   ;;  %v264_v55 = vld [vmem:[%s826_s8 + $0x8] sm:$0xff] }
   0x4   :  { %v50_v5 = vand.u32 15, %v42_v4  ;;  %v621_v21 = vld [vmem:[%s824_s3] sm:$0xff]   ;;  %vm43_vm4 = vcmp.lt.s32.totalorder %v42_v4, 32  ;;  %617 = vset.pattern.permute.xlu1 %v637_v39  ;;  %618 = vset.pattern.permute.xlu0 %v637_v39 }
   0x5   :  { %v753_v22 = vsel %vm43_vm4, 1.0, %v633_v1  ;;  %v255_v46 = vld [vmem:[%s825_s7] sm:$0xff] }
   0x6   :  { %66 = vrot.lane.b32.xlu0 %v713_v2, %s635_s19  ;;  %72 = vrot.lane.b32.xlu1 %v713_v2, %s636_s20  ;;  %vm58_vm1 = vcmp.ge.s32.totalorder %v50_v5, 1  ;;  %vm61_vm3 = vcmp.le.s32.totalorder %v50_v5, 14  ;;  %v263_v49 = vld [vmem:[%s826_s8] sm:$0xff] }
   0x7   :  { %v723_v7 = vsel %vm58_vm1, 1.0, %v633_v1  ;;  %v737_v15 = vsel %vm61_vm3, 1.0, %v633_v1 }
  0x74   :  { %v65_v6 = vpop.permute.xlu0 %64  ;;  %v71_v12 = vpop.permute.xlu1 %70 }
  0x75   :  { %v68_v9 = vmul.f32 %v723_v7, %v65_v6  ;;  %v74_v17 = vmul.f32 %v737_v15, %v71_v12 }
  0x78   :  { %v67_v8 = vpop.permute.xlu0 %66  ;;  %v73_v16 = vpop.permute.xlu1 %72 }
  0x79   :  { %v69_v10 = vmul.f32 %v723_v7, %v67_v8  ;;  %v75_v18 = vmul.f32 %v737_v15, %v73_v16 }
  0x7b   :  { %v81_v11 = vpack.c.bf16 %v69_v10, %v68_v9  ;;  %v183_v20 = vpack.c.bf16 %v75_v18, %v74_v17  ;;  %v623_v18 = vld [vmem:[%s828_s5] sm:$0xff]  }
  0x7d   :  { %561 = vmatpush3.bf16.msra.mxu0 %v81_v11 }
  0x7e   :  { %566 = vmatprep.subr.bf16.mxu0 %v633_v1 }
  0x80   :  { %563 = vmatmul.mubr.msk.bf16.vlgmr.msra.gmra.mrb[0].mxu0 %vm87_vm2, %v619_v13 }
  0x81   :  { %567 = vmatpush3.bf16.msra.mxu0 %v78_v14  ;;  %568 = vmatprep.mubr.msk.bf16.mxu0 %vm634_vm0, %v633_v1  ;;  %v622_v14 = vld [vmem:[%s827_s4] sm:$0xff]  }
  0x82   :  { %572 = vmatprep.subr.bf16.mxu0 %v633_v1 }
  0x8c   :  { %569 = vmatmul.mubr.msk.bf16.vlgmr.msra.gmra.mrb[0].mxu0 %vm87_vm2, %v620_v19 }
  0x8d   :  { %573 = vmatpush3.bf16.msra.mxu0 %v183_v20  ;;  %574 = vmatprep.mubr.msk.bf16.mxu0 %vm634_vm0, %v633_v1 }
  0x98   :  { %575 = vmatmul.mubr.msk.bf16.vlgmr.msra.gmra.mrb[0].mxu0 %vm87_vm2, %v621_v21  ;;  %v624_v21 = vld [vmem:[%s829_s6] sm:$0xff]  }
 0x16b   :  { %v226_v23 = vpop.f32.mrb[0].mxu0 }
 0x16c   :  { %v576_v24 = vpop.f32.mrb[1].mxu0  ;;  %v235_v25 = vmul.f32 %v753_v22, %v226_v23 }
 0x16d   :  { %v229_v26 = vpop.f32.mrb[2].mxu0 }
 0x16e   :  { %237 = vadd.xlane.f32.xlu0 %v235_v25  ;;  %v577_v27 = vpop.f32.mrb[3].mxu0  ;;  %v236_v28 = vmul.f32 %v753_v22, %v229_v26 }
 0x170   :  { %239 = vadd.xlane.f32.xlu1 %v236_v28 }
 0x1fb   :  { %v238_v29 = vpop.xlane.xlu0 %237 }
 0x1fc   :  { %v241_v30 = vmul.f32 0.03125, %v238_v29 }
 0x1fd   :  { %v240_v31 = vpop.xlane.xlu1 %239 }
 0x1fe   :  { %v243_v32 = vsub.f32 %v226_v23, %v241_v30  ;;  %v242_v33 = vmul.f32 0.03125, %v240_v31 }
 0x200   :  { %v244_v34 = vsub.f32 %v229_v26, %v242_v33  ;;  %v245_v35 = vmul.f32 %v753_v22, %v243_v32 }
 0x202   :  { %v247_v36 = vmul.f32 %v245_v35, %v245_v35  ;;  %v246_v37 = vmul.f32 %v753_v22, %v244_v34 }
 0x204   :  { %249 = vadd.xlane.f32.xlu0 %v247_v36  ;;  %v248_v38 = vmul.f32 %v246_v37, %v246_v37 }
 0x208   :  { %251 = vadd.xlane.f32.xlu0 %v248_v38 }
 0x291   :  { %v250_v40 = vpop.xlane.xlu0 %249 }
 0x292   :  { %v253_v41 = vmul.f32 0.03125, %v250_v40 }
 0x294   :  { %v257_v42 = vadd.f32 1e-05, %v253_v41 }
 0x295   :  { %v252_v43 = vpop.xlane.xlu0 %251 }
 0x296   :  { %625 = vrsqrt.f32 %v257_v42  ;;  %v254_v44 = vmul.f32 0.03125, %v252_v43  ;;  %v485_v43 = vld [vmem:[%s830_s9] sm:$0xff] }
 0x298   :  { %v258_v45 = vadd.f32 1e-05, %v254_v44 }
 0x29a   :  { %627 = vrsqrt.f32 %v258_v45 }
 0x2a0   :  { %v626_v47 = vpop.eup %625 }
 0x2a1   :  { %v261_v48 = vmul.f32 %v626_v47, %v255_v46  ;;  %v493_v47 = vld [vmem:[%s831_s10] sm:$0xff] }
 0x2a3   :  { %271 = vperm.xlu1 %617, %v261_v48   ;;  %v265_v51 = vmul.f32 %v261_v48, %v241_v30 }
 0x2a4   :  { %v628_v52 = vpop.eup %627 }
 0x2a5   :  { %v267_v53 = vsub.f32 %v263_v49, %v265_v51  ;;  %v262_v54 = vmul.f32 %v628_v52, %v256_v50  ;;  %v494_v52 = vld [vmem:[%s831_s10 + $0x8] sm:$0xff] }
 0x2a7   :  { %283 = vperm.xlu1 %617, %v267_v53   ;;  %276 = vperm.xlu0 %618, %v262_v54   ;;  %v266_v56 = vmul.f32 %v262_v54, %v242_v33 }
 0x2a9   :  { %v268_v57 = vsub.f32 %v264_v55, %v266_v56 }
 0x2ab   :  { %288 = vperm.xlu1 %617, %v268_v57  }
 0x322   :  { %v272_v58 = vpop.permute.xlu1 %271 }
 0x323   :  { %v279_v59 = vmul.f32 %v272_v58, %v226_v23 }
 0x326   :  { %v277_v60 = vpop.permute.xlu0 %276  ;;  %v284_v61 = vpop.permute.xlu1 %283 }
 0x327   :  { %v291_v62 = vadd.f32 %v284_v61, %v279_v59  ;;  %v280_v63 = vmul.f32 %v277_v60, %v229_v26 }
 0x329   :  { %v293_v3 = vmax.f32 %v291_v62, 0.0 }
 0x32a   :  { %v289_v4 = vpop.permute.xlu1 %288 }
 0x32b   :  { %v292_v5 = vadd.f32 %v289_v4, %v280_v63  ;;  %295 = vrot.lane.b32.xlu1 %v293_v3, %s635_s19 }
 0x32d   :  { %v294_v6 = vmax.f32 %v292_v5, 0.0 }
 0x32f   :  { %v309_v8 = vpack.c.bf16 %v294_v6, %v293_v3  ;;  %297 = vrot.lane.b32.xlu1 %v294_v6, %s635_s19 }
 0x333   :  { %301 = vrot.lane.b32.xlu1 %v293_v3, %s636_s20 }
 0x337   :  { %303 = vrot.lane.b32.xlu1 %v294_v6, %s636_s20 }
 0x39d   :  { %v296_v9 = vpop.permute.xlu1 %295 }
 0x39e   :  { %v299_v11 = vmul.f32 %v723_v7, %v296_v9 }
 0x3a1   :  { %v298_v10 = vpop.permute.xlu1 %297 }
 0x3a2   :  { %v300_v12 = vmul.f32 %v723_v7, %v298_v10 }
 0x3a4   :  { %v312_v13 = vpack.c.bf16 %v300_v12, %v299_v11 }
 0x3a5   :  { %v302_v16 = vpop.permute.xlu1 %301 }
 0x3a6   :  { %579 = vmatpush3.bf16.msra.mxu1 %v312_v13  ;;  %v305_v19 = vmul.f32 %v737_v15, %v302_v16 }
 0x3a7   :  { %584 = vmatprep.subr.bf16.mxu1 %v633_v1 }
 0x3a9   :  { %581 = vmatmul.mubr.msk.bf16.vlgmr.msra.gmra.mrb[0].mxu1 %vm87_vm2, %v622_v14  ;;  %v304_v17 = vpop.permute.xlu1 %303 }
 0x3aa   :  { %585 = vmatpush3.bf16.msra.mxu1 %v309_v8  ;;  %586 = vmatprep.mubr.msk.bf16.mxu1 %vm634_vm0, %v633_v1  ;;  %v306_v7 = vmul.f32 %v737_v15, %v304_v17 }
 0x3ab   :  { %590 = vmatprep.subr.bf16.mxu1 %v633_v1 }
 0x3ac   :  { %v413_v20 = vpack.c.bf16 %v306_v7, %v305_v19 }
 0x3b5   :  { %587 = vmatmul.mubr.msk.bf16.vlgmr.msra.gmra.mrb[0].mxu1 %vm87_vm2, %v623_v18 }
 0x3b6   :  { %591 = vmatpush3.bf16.msra.mxu1 %v413_v20  ;;  %592 = vmatprep.mubr.msk.bf16.mxu1 %vm634_vm0, %v633_v1 }
 0x3c1   :  { %593 = vmatmul.mubr.msk.bf16.vlgmr.msra.gmra.mrb[0].mxu1 %vm87_vm2, %v624_v21 }
 0x494   :  { %v456_v23 = vpop.f32.mrb[0].mxu1 }
 0x495   :  { %v594_v24 = vpop.f32.mrb[1].mxu1  ;;  %v465_v25 = vmul.f32 %v753_v22, %v456_v23 }
 0x496   :  { %v459_v26 = vpop.f32.mrb[2].mxu1 }
 0x497   :  { %467 = vadd.xlane.f32.xlu1 %v465_v25  ;;  %v595_v15 = vpop.f32.mrb[3].mxu1  ;;  %v466_v27 = vmul.f32 %v753_v22, %v459_v26 }
 0x499   :  { %469 = vadd.xlane.f32.xlu0 %v466_v27 }
 0x524   :  { %v468_v28 = vpop.xlane.xlu1 %467 }
 0x525   :  { %v471_v29 = vmul.f32 0.03125, %v468_v28 }
 0x526   :  { %v470_v30 = vpop.xlane.xlu0 %469 }
 0x527   :  { %v473_v1 = vsub.f32 %v456_v23, %v471_v29  ;;  %v472_v31 = vmul.f32 0.03125, %v470_v30 }
 0x529   :  { %v474_v32 = vsub.f32 %v459_v26, %v472_v31  ;;  %v475_v33 = vmul.f32 %v753_v22, %v473_v1 }
 0x52b   :  { %v477_v34 = vmul.f32 %v475_v33, %v475_v33  ;;  %v476_v35 = vmul.f32 %v753_v22, %v474_v32  ;;  %v486_v22 = vld [vmem:[%s830_s9 + $0x8] sm:$0xff] }
 0x52d   :  { %479 = vadd.xlane.f32.xlu1 %v477_v34  ;;  %v478_v36 = vmul.f32 %v476_v35, %v476_v35 }
 0x52f   :  { %481 = vadd.xlane.f32.xlu0 %v478_v36 }
 0x5ba   :  { %v480_v37 = vpop.xlane.xlu1 %479 }
 0x5bb   :  { %v483_v38 = vmul.f32 0.03125, %v480_v37 }
 0x5bc   :  { %v482_v39 = vpop.xlane.xlu0 %481 }
 0x5bd   :  { %v487_v40 = vadd.f32 1e-05, %v483_v38  ;;  %v484_v41 = vmul.f32 0.03125, %v482_v39 }
 0x5bf   :  { %629 = vrsqrt.f32 %v487_v40  ;;  %v488_v42 = vadd.f32 1e-05, %v484_v41 }
 0x5c1   :  { %631 = vrsqrt.f32 %v488_v42 }
 0x5c9   :  { %v630_v44 = vpop.eup %629 }
 0x5ca   :  { %v491_v45 = vmul.f32 %v630_v44, %v485_v43 }
 0x5cb   :  { %v632_v46 = vpop.eup %631 }
 0x5cc   :  { %501 = vperm.xlu1 %617, %v491_v45   ;;  %v492_v48 = vmul.f32 %v632_v46, %v486_v22  ;;  %v495_v49 = vmul.f32 %v491_v45, %v471_v29 }
 0x5ce   :  { %506 = vperm.xlu0 %618, %v492_v48   ;;  %v497_v50 = vsub.f32 %v493_v47, %v495_v49  ;;  %v496_v51 = vmul.f32 %v492_v48, %v472_v31 }
 0x5d0   :  { %513 = vperm.xlu1 %617, %v497_v50   ;;  %v498_v53 = vsub.f32 %v494_v52, %v496_v51 }
 0x5d4   :  { %518 = vperm.xlu1 %617, %v498_v53  }
 0x64b   :  { %v502_v54 = vpop.permute.xlu1 %501 }
 0x64c   :  { %v509_v55 = vmul.f32 %v502_v54, %v456_v23 }
 0x64d   :  { %v507_v56 = vpop.permute.xlu0 %506 }
 0x64e   :  { %v510_v59 = vmul.f32 %v507_v56, %v459_v26 }
 0x64f   :  { %v514_v57 = vpop.permute.xlu1 %513 }
 0x650   :  { %v521_v58 = vadd.f32 %v514_v57, %v509_v55 }
 0x652   :  { %v523_v60 = vadd.f32 %v521_v58, %v701_v0 }
 0x653   :  { %v519_v61 = vpop.permute.xlu1 %518 }
 0x654   :  { %v525_v62 = vmax.f32 %v523_v60, 0.0  ;;  %v522_v63 = vadd.f32 %v519_v61, %v510_v59 }
 0x656   :  { %527 = vst [vmem:[%s832_s11] sm:$0xff] %v525_v62  ;;  %v524_v3 = vadd.f32 %v522_v63, %v713_v2 }
 0x658   :  { %v526_v4 = vmax.f32 %v524_v3, 0.0 }
 0x65a   :  { %528 = vst [vmem:[%s832_s11 + $0x8] sm:$0xff] %v526_v4 }

// kernel: prediction_network_forward.10
= control target key start
LH: loop header
LB: loop body
LE: loop exit
PB: predicated region body
PF: predicated region fallthrough
CT: control target
= control target key end

     0   :  { %v315_v3 = vmov 0.0|0.0   ;;  %vm316_vm0 = vmmov 0   ;;  %v317_v6 = vmov 0.0   ;;  %s406_s0 = inlined_call_operand.vmem [shape: f32[2,64], index: 0, kind: input, shape index: {}]   ;;  %s407_s1 = inlined_call_operand.vmem [shape: f32[64,32], index: 1, kind: input, shape index: {}]   ;;  %s408_s2 = inlined_call_operand.vmem [shape: f32[1,32], index: 2, kind: input, shape index: {}]   ;;  %s409_s3 = inlined_call_operand.vmem [shape: f32[32,6], index: 3, kind: input, shape index: {}]   ;;  %s410_s4 = inlined_call_operand.vmem [shape: f32[1,6], index: 4, kind: input, shape index: {}]   ;;  %s411_s5 = inlined_call_operand.hbm [shape: f32[2,6], index: 5, kind: output, shape index: {}]  }
   0x1   :  { %v22_v0 = vld [vmem:[%s407_s1] sm:$0xff]  ;;  %v23_v1 = vld [vmem:[%s407_s1 + $0x8] sm:$0xff]  ;;  %v24_v2 = vld [vmem:[%s407_s1 + $0x10] sm:$0xff]  ;;  %267 = vmatprep.subr.bf16.mxu0 %v315_v3  ;;  %253 = vmatprep.mubr.msk.f32.mxu0 %vm316_vm0, %v317_v6 }
   0x2   :  { %v268_v4 = vpack.c.bf16 %v23_v1, %v22_v0  ;;  %v25_v5 = vld [vmem:[%s407_s1 + $0x18] sm:$0xff]  ;;  %279 = vmatprep.subr.bf16.mxu1 %v315_v3  ;;  %264 = vmatprep.mubr.msk.f32.mxu1 %vm316_vm0, %v317_v6 }
   0x3   :  { %v271_v7 = vpack.c.bf16 %v25_v5, %v24_v2 }
   0x4   :  { %269 = vmatpush3.bf16.msra.mxu0 %v268_v4 }
   0x5   :  { %10 = vsyncpa [#allocation3], 0  ;;  %270 = vmatprep.subr.bf16.mxu0 %v315_v3  ;;  %v26_v8 = vld [vmem:[%s407_s1 + $0x20] sm:$0xff]  ;;  %v27_v9 = vld [vmem:[%s407_s1 + $0x28] sm:$0xff]  ;;  %vm37_vm1 = vcmask 523264   ;;  %vm128_vm2 = vcmask 261120  }
   0x6   :  { %v274_v10 = vpack.c.bf16 %v27_v9, %v26_v8  ;;  %v28_v11 = vld [vmem:[%s407_s1 + $0x30] sm:$0xff]  ;;  %v29_v12 = vld [vmem:[%s407_s1 + $0x38] sm:$0xff]  ;;  %v21_v14 = vld [vmem:[%s406_s0] sm:$0x3]  ;;  %s318_s20 = smov [#allocation2]   ;;  %vm202_vm4 = vcmask 41984  }
   0x7   :  { %v277_v13 = vpack.c.bf16 %v29_v12, %v28_v11  ;;  %v117_v15 = vld [vmem:[%s409_s3] sm:$0xff]  ;;  %v118_v16 = vld [vmem:[%s409_s3 + $0x8] sm:$0xff]  ;;  %v119_v17 = vld [vmem:[%s409_s3 + $0x10] sm:$0xff]  ;;  %s210_s21 = sshll.u32 %s318_s20, 4  ;;  %s211_s21 = int_to_ptr.vmem [resolvable:$true] %s210_s21 }
   0x8   :  { %272 = vmatpush3.bf16.msra.mxu0 %v271_v7  ;;  %v280_v18 = vpack.c.bf16 %v118_v16, %v117_v15  ;;  %v120_v19 = vld [vmem:[%s409_s3 + $0x18] sm:$0xff]  ;;  %v218_v21 = vld [vmem:[%s408_s2] ss:$0 sm:$0xff]  ;;  %s291_s2 = scalar_lea.vmem %s211_s21, 32  ;;  %p296_p1 = scmp.lt.s32.totalorder %s211_s21, %s211_s21 }
   0x9   :  { %273 = vmatprep.subr.bf16.mxu0 %v315_v3  ;;  %v283_v20 = vpack.c.bf16 %v120_v19, %v119_v17  ;;  %v221_v30 = vld [vmem:[%s410_s4] ss:$0 sm:$0xff]  ;;  %p292_p0 = scmp.ne.s32.totalorder %s211_s21, %s291_s2  ;;  %p297_p2 = scmp.lt.s32.totalorder %s291_s2, %s291_s2 }
   0xa   :  { %281 = vmatpush3.bf16.msra.mxu1 %v280_v18 }
   0xb   :  { %282 = vmatprep.subr.bf16.mxu1 %v315_v3  ;;  %p298_p3 = por %p297_p2, %p296_p1 }
   0xc   :  { %275 = vmatpush3.bf16.msra.mxu0 %v274_v10 }
   0xd   :  { %276 = vmatprep.subr.bf16.mxu0 %v315_v3  ;;  %p299_p4 = pnand %p298_p3, %p292_p0 }
   0xe   :  { %284 = vmatpush3.bf16.msra.mxu1 %v283_v20 }
  0x10   :  { %278 = vmatpush3.bf16.msra.mxu0 %v277_v13 }
  0x13   :  { %254 = vmatmul.mubr.msk.f32.vlgmr.msra.gmra.mrb[0].mxu0 %vm37_vm1, %v21_v14 }
  0xe6   :  { %v107_v22 = vpop.f32.mrb[0].mxu0 }
  0xe7   :  { %v108_v23 = vadd.f32 %v218_v21, %v107_v22  ;;  %v255_v24 = vpop.f32.mrb[1].mxu0 }
  0xe9   :  { %v112_v25 = vmin.f32 %v108_v23, 0.0  ;;  %vm111_vm3 = vcmp.gt.f32.partialorder %v108_v23, 0.0 }
  0xeb   :  { %v113_v26 = vmul.f32 1.442695, %v112_v25 }
  0xed   :  { %289 = vpow2.f32 %v113_v26 }
  0xf7   :  { %v290_v27 = vpop.eup %289 }
  0xf8   :  { %v220_v28 = vadd.f32 -1.0, %v290_v27 }
  0xfa   :  { %v116_v29 = vsel %vm111_vm3, %v108_v23, %v220_v28 }
  0xfb   :  { %265 = vmatmul.mubr.msk.f32.vlgmr.msra.gmra.mrb[0].mxu1 %vm128_vm2, %v116_v29 }
 0x1ce   :  { %v198_v31 = vpop.f32.mrb[0].mxu1 }
 0x1cf   :  { %v199_v32 = vadd.f32 %v221_v30, %v198_v31  ;;  %v266_v33 = vpop.f32.mrb[1].mxu1 }
 0x1d1   :  { %203 = vst.msk [vmem:[#allocation2] sm:$0x3] %vm202_vm4, %v199_v32 }
 0x1d2   :  { %302 = shalt.err (!%p299_p4)
}
 0x1d3   :  { %s303_s24 = scalar_lea.hbm %s411_s5, 32 }
 0x1d4   :  { %p304_p5 = scmp.ne.s32.totalorder %s411_s5, %s303_s24  ;;  %p307_p6 = scmp.lt.u32.totalorder %s303_s24, %s411_s5 }
 0x1d6   :  { %p309_p7 = pnand %p307_p6, %p304_p5 }
 0x1d8   :  { %312 = shalt.err (!%p309_p7)
}
 0x1d9   :  { %213 = dma.vmem_to_hbm [thread:$0]  %s211_s21, 32, %s411_s5, [#allocation3]  }
 0x1da   :  { %313 = dma.done.wait [#allocation3], 32  }
 0x1db   :  { %314 = vsyncadd [#allocation3], 4294967264 }
 0x1dc   :  { %217 = vsyncpa [#allocation3], 1 }

</bundles_post_ra>
